<compile_context>
chip_gen: v7x
topology: tpu7x:2x2x1
jax: 0.10.0
libtpu: 0.0.40
codegen_flags: <defaults>
</compile_context>

<pallas_src>
import functools

import jax
import jax.numpy as jnp
import numpy as np
from jax.experimental import pallas as pl
from jax.experimental.pallas import tpu as pltpu


# ----------------------------- activation math ------------------------------

def _act_with_grads(name, x):
    """Activation value, 1st and 2nd derivative (elementwise), matching the torch classes."""
    if name == "tanh":
        y = jnp.tanh(x)
        g1 = 1.0 - y * y            # Tanh.grad(ord=1)
        g2 = -2.0 * y * g1          # Tanh.grad(ord=2)
    elif name in ("sin", "siren"):
        y = jnp.sin(x)
        g1 = jnp.cos(x)
        g2 = -jnp.sin(x)
    elif name == "sigmoid":
        y = 1.0 / (1.0 + jnp.exp(-x))
        g1 = y * (1.0 - y)
        g2 = (1.0 - 2.0 * y) * g1
    elif name in ("relu", "leaky_relu", "lrelu"):
        slope = 0.0 if name == "relu" else 0.01
        y = jnp.where(x >= 0, x, slope * x)
        g1 = jnp.where(x >= 0, 1.0, slope)
        g2 = jnp.zeros_like(x)
    elif name == "none":
        y = x
        g1 = jnp.ones_like(x)
        g2 = jnp.zeros_like(x)
    else:
        raise NotImplementedError(name)
    return y, g1, g2


# ----------------------------- Pallas kernel --------------------------------

def _resnet_kernel(*refs, activations, num_layers, d_in, n_h, bt):
    """One batch-tile per grid step; fused value/Jacobian/Hessian propagation.

    refs = (x, J, Hd, Wt_0, b_0, ..., Wt_{L-1}, b_{L-1},
            y_out, J_out, H_out, slab)
      x     : (bt, D)             value path
      J, Hd : (Hn, bt, D)         Jacobian / Hessian-diag (D on the lane axis)
      Wt_l  : (Dp, Dp)            pre-transposed, zero-padded weight
      b_l   : (1, Dp)             zero-padded bias
      *_out : (bt, Dp) / (Hn, bt, Dp)   lane-dense padded outputs
      slab  : VMEM ((2*Hn+1)*bt, Dp)    persistent fused state
    """
    x_ref, j_ref, h_ref = refs[:3]
    wb_refs = refs[3:3 + 2 * num_layers]
    y_out_ref, j_out_ref, h_out_ref, slab_ref = refs[3 + 2 * num_layers:]

    rows, dp = slab_ref.shape
    rj = n_h * bt                      # rows of the Jacobian / Hessian segments
    r1 = bt                            # end of value segment
    r2 = bt + rj                       # end of Jacobian segment

    # ---- stage inputs into the slab: [ value rows | Jacobian rows | Hessian rows ]
    # Zero the padded lane columns so layer-0's contraction over Dp never sees
    # uninitialized VMEM (matters for the first grid step on each core).
    if d_in < dp:
        slab_ref[:, d_in:dp] = jnp.zeros((rows, dp - d_in), jnp.float32)
    slab_ref[0:r1, 0:d_in] = x_ref[...]
    slab_ref[r1:r2, 0:d_in] = j_ref[...].reshape(rj, d_in)
    slab_ref[r2:rows, 0:d_in] = h_ref[...].reshape(rj, d_in)

    # ---- layer loop: one MXU matmul per layer on the whole slab ----
    for l in range(num_layers):
        wt = wb_refs[2 * l][...]                      # (Dp, Dp)
        b = wb_refs[2 * l + 1][...]                   # (1, Dp)

        zl = jnp.dot(slab_ref[...], wt,
                     preferred_element_type=jnp.float32)   # (rows, Dp)

        y_lin = zl[0:r1] + b
        j_lin = zl[r1:r2]
        h_lin = zl[r2:rows]

        # elementwise activation + chain rule (VPU / EUP)
        y, g1, g2 = _act_with_grads(activations[l], y_lin)

        j3 = j_lin.reshape(n_h, bt, dp)
        h3 = h_lin.reshape(n_h, bt, dp)
        g1b = g1[None, :, :]
        j_new = g1b * j3
        h_new = g2[None, :, :] * (j3 * j3) + h3 * g1b

        # slice-store the three segments back into the persistent slab
        slab_ref[0:r1, :] = y
        slab_ref[r1:r2, :] = j_new.reshape(rj, dp)
        slab_ref[r2:rows, :] = h_new.reshape(rj, dp)

    # ---- residual add (in VMEM, on the real [:, :D] columns only) ----
    slab_ref[0:r1, 0:d_in] = slab_ref[0:r1, 0:d_in] + x_ref[...]
    slab_ref[r1:r2, 0:d_in] = slab_ref[r1:r2, 0:d_in] + j_ref[...].reshape(rj, d_in)
    slab_ref[r2:rows, 0:d_in] = slab_ref[r2:rows, 0:d_in] + h_ref[...].reshape(rj, d_in)

    # ---- epilogue: lane-dense (width Dp) HBM stores; wrapper slices [:, :D] ----
    y_out_ref[...] = slab_ref[0:r1, :]
    j_out_ref[...] = slab_ref[r1:r2, :].reshape(n_h, bt, dp)
    h_out_ref[...] = slab_ref[r2:rows, :].reshape(n_h, bt, dp)


# ------------------------------- wrappers ------------------------------------

def _round_up(v, m):
    return ((v + m - 1) // m) * m


def resnet_forward_kernel_layout(x, J, H, weights, biases, activations, *, block_b=None):
    """Kernel-native layout: x (B, D); J, H (Hn, B, D). Returns the same layout.

    Use this entry point when chaining calls to avoid (B,D,Hn)<->(Hn,B,D) HBM
    transpose passes; only convert at the true torch boundary.
    """
    x = jnp.asarray(x, jnp.float32)
    J = jnp.asarray(J, jnp.float32)
    H = jnp.asarray(H, jnp.float32)
    B, D = x.shape
    Hn = J.shape[0]
    num_layers = len(weights)
    assert num_layers == len(biases) == len(activations) and num_layers >= 1
    # Residual add requires out_dim == in_dim (ResNet sets in_dim = h_dims[-1]).
    assert int(weights[-1].shape[0]) == D, "ResNet residual needs out_dim == in_dim"

    dims = [D] + [int(W.shape[0]) for W in weights]
    Dp = _round_up(max(max(dims), 128), 128)          # lane-aligned common width

    # Batch tile: largest multiple of 8 such that the fused slab height
    # (2*Hn+1)*bt fits one 256-row MXU pass (v6e/v7x; also 2 aligned 128-row
    # passes on v5e).  Pad B up to a multiple of bt -- no silent bt=B fallback.
    rows_per_b = 2 * Hn + 1
    if block_b is None:
        bt = max(8, ((256 // rows_per_b) // 8) * 8)
    else:
        assert block_b >= 8 and block_b % 8 == 0, "block_b must be a multiple of 8"
        bt = block_b
    bt = min(bt, _round_up(B, 8))
    Bp = _round_up(B, bt)
    if Bp != B:
        x = jnp.pad(x, ((0, Bp - B), (0, 0)))
        J = jnp.pad(J, ((0, 0), (0, Bp - B), (0, 0)))
        H = jnp.pad(H, ((0, 0), (0, Bp - B), (0, 0)))

    # Pre-transpose and zero-pad weights/biases to a uniform (Dp, Dp) once.
    # Padded rows are zero, so padded slab columns never contaminate real columns.
    wb_args, wb_specs = [], []
    for W, b in zip(weights, biases):
        W = jnp.asarray(W, jnp.float32)               # (d_out, d_prev)
        b = jnp.asarray(b, jnp.float32)
        d_out, d_prev = int(W.shape[0]), int(W.shape[1])
        Wt = jnp.zeros((Dp, Dp), jnp.float32).at[:d_prev, :d_out].set(W.T)
        bp = jnp.zeros((1, Dp), jnp.float32).at[0, :d_out].set(b)
        wb_args += [Wt, bp]
        # constant index_map -> weights stay resident in VMEM across grid steps
        # (pipeline_mode=pl.Buffered(1) would halve their footprint; irrelevant at Dp=128)
        wb_specs += [pl.BlockSpec((Dp, Dp), lambda i: (0, 0)),
                     pl.BlockSpec((1, Dp), lambda i: (0, 0))]

    grid = (Bp // bt,)
    rows = rows_per_b * bt

    kernel = functools.partial(_resnet_kernel,
                               activations=tuple(activations),
                               num_layers=num_layers,
                               d_in=D, n_h=Hn, bt=bt)

    cost = pl.CostEstimate(
        flops=2 * rows_per_b * Bp * Dp * Dp * num_layers,
        transcendentals=rows_per_b * Bp * Dp * num_layers,
        bytes_accessed=4 * (rows_per_b * Bp * D            # inputs
                            + rows_per_b * Bp * Dp          # padded outputs
                            + num_layers * (Dp * Dp + Dp)), # weights + biases
    )

    y, J_out, H_out = pl.pallas_call(
        kernel,
        grid=grid,
        in_specs=[
            pl.BlockSpec((bt, D), lambda i: (i, 0)),
            pl.BlockSpec((Hn, bt, D), lambda i: (0, i, 0)),
            pl.BlockSpec((Hn, bt, D), lambda i: (0, i, 0)),
            *wb_specs,
        ],
        out_specs=(
            pl.BlockSpec((bt, Dp), lambda i: (i, 0)),
            pl.BlockSpec((Hn, bt, Dp), lambda i: (0, i, 0)),
            pl.BlockSpec((Hn, bt, Dp), lambda i: (0, i, 0)),
        ),
        out_shape=(
            jax.ShapeDtypeStruct((Bp, Dp), jnp.float32),
            jax.ShapeDtypeStruct((Hn, Bp, Dp), jnp.float32),
            jax.ShapeDtypeStruct((Hn, Bp, Dp), jnp.float32),
        ),
        scratch_shapes=[pltpu.VMEM((rows, Dp), jnp.float32)],
        compiler_params=pltpu.CompilerParams(
            dimension_semantics=("parallel",),
            # footprint here is ~2 MiB; 32 MiB limit leaves >=50% headroom even
            # on v7x's 64 MiB physical VMEM and raises v5e's 16 MiB scoped default.
            vmem_limit_bytes=32 * 1024 * 1024,
        ),
        cost_estimate=cost,
    )(x, J, H, *wb_args)

    # Drop batch / lane padding (stores were lane-dense in-kernel; slicing here is cheap).
    return y[:B, :D], J_out[:, :B, :D], H_out[:, :B, :D]


def resnet_forward(x, dx_dh, d2x_dh2, weights, biases, activations, *, block_b=None):
    """Torch-layout wrapper: x (B, D); dx_dh, d2x_dh2 (B, D, Hn). Returns same layout."""
    # TODO(synk): callers that can hold J/H in (Hn, B, D) across calls should use
    # resnet_forward_kernel_layout directly and skip these 4 boundary transpose passes.
    J_in = jnp.transpose(jnp.asarray(dx_dh, jnp.float32), (2, 0, 1))
    H_in = jnp.transpose(jnp.asarray(d2x_dh2, jnp.float32), (2, 0, 1))
    y, J_out, H_out = resnet_forward_kernel_layout(
        jnp.asarray(x, jnp.float32), J_in, H_in, weights, biases, activations,
        block_b=block_b)
    return (y,
            jnp.transpose(J_out, (1, 2, 0)),
            jnp.transpose(H_out, (1, 2, 0)))


# -------------------------- pure-JAX reference -------------------------------

def resnet_reference(x, dx_dh, d2x_dh2, weights, biases, activations):
    """Direct transcription of the torch forward (torch layouts)."""
    y, J, Hd = x, dx_dh, d2x_dh2
    x0, J0, H0 = x, dx_dh, d2x_dh2
    for W, b, act in zip(weights, biases, activations):
        y_lin = y @ W.T + b                              # (B, O)
        J_lin = jnp.einsum("oi,bih->boh", W, J)          # W @ dx_dh
        H_lin = jnp.einsum("oi,bih->boh", W, Hd)
        yy, g1, g2 = _act_with_grads(act, y_lin)
        J_new = g1[..., None] * J_lin
        Hd = g2[..., None] * J_lin ** 2 + H_lin * g1[..., None]
        J = J_new
        y = yy
    return y + x0, J + J0, Hd + H0


# --------------------------------- main ---------------------------------------

if __name__ == "__main__":
    # ResNet(h_dims=[48, 64, 32], activations=['tanh', 'sigmoid', 'sin'])
    h_dims = [48, 64, 32]
    activations = ["tanh", "sigmoid", "sin"]
    in_dim = h_dims[-1]            # ResNet sets in_dim = h_dims[-1]

    B, D, Hn = 32, in_dim, 4       # batch, feature dim, n hidden coords

    key = jax.random.PRNGKey(0)
    keys = jax.random.split(key, 3 + 2 * len(h_dims))

    # deterministic torch-Linear-like init
    weights, biases = [], []
    d_in = in_dim
    for i, d_out in enumerate(h_dims):
        bound = 1.0 / np.sqrt(d_in)
        W = jax.random.uniform(keys[2 * i], (d_out, d_in), jnp.float32,
                               -bound, bound)
        b = jax.random.uniform(keys[2 * i + 1], (d_out,), jnp.float32,
                               -bound, bound)
        weights.append(W)
        biases.append(b)
        d_in = d_out

    x = jax.random.normal(keys[-3], (B, D), jnp.float32)
    dx_dh = jax.random.normal(keys[-2], (B, D, Hn), jnp.float32)
    d2x_dh2 = jax.random.normal(keys[-1], (B, D, Hn), jnp.float32)

    y, dy_dh, d2y_dh2 = resnet_forward(x, dx_dh, d2x_dh2,
                                       weights, biases, activations)
    jax.block_until_ready((y, dy_dh, d2y_dh2))

    y_ref, dy_ref, d2y_ref = resnet_reference(x, dx_dh, d2x_dh2,
                                              weights, biases, activations)

    np.testing.assert_allclose(np.asarray(y), np.asarray(y_ref),
                               rtol=1e-5, atol=1e-5)
    np.testing.assert_allclose(np.asarray(dy_dh), np.asarray(dy_ref),
                               rtol=1e-5, atol=1e-5)
    np.testing.assert_allclose(np.asarray(d2y_dh2), np.asarray(d2y_ref),
                               rtol=1e-5, atol=1e-5)

    print("KERNEL_OK")
</pallas_src>

<mosaic_0001>
module attributes {stable_mosaic.version = 11 : i64} {
  func.func @_resnet_kernel(%arg0: i32, %arg1: memref<24x32xf32, #tpu.memory_space<vmem>>, %arg2: memref<4x24x32xf32, #tpu.memory_space<vmem>>, %arg3: memref<4x24x32xf32, #tpu.memory_space<vmem>>, %arg4: memref<128x128xf32, #tpu.memory_space<vmem>>, %arg5: memref<1x128xf32, #tpu.memory_space<vmem>>, %arg6: memref<128x128xf32, #tpu.memory_space<vmem>>, %arg7: memref<1x128xf32, #tpu.memory_space<vmem>>, %arg8: memref<128x128xf32, #tpu.memory_space<vmem>>, %arg9: memref<1x128xf32, #tpu.memory_space<vmem>>, %arg10: memref<24x128xf32, #tpu.memory_space<vmem>>, %arg11: memref<4x24x128xf32, #tpu.memory_space<vmem>>, %arg12: memref<4x24x128xf32, #tpu.memory_space<vmem>>, %arg13: memref<216x128xf32, #tpu.memory_space<vmem>>) attributes {dimension_semantics = [#tpu.dimension_semantics<parallel>], iteration_bounds = array<i64: 2>, scalar_prefetch = 0 : i64, scratch_operands = 1 : i64, tpu.core_type = #tpu.core_type<tc>, window_params = [{transform_indices = @transform_0, window_bounds = array<i64: 24, 32>}, {transform_indices = @transform_1, window_bounds = array<i64: 4, 24, 32>}, {transform_indices = @transform_2, window_bounds = array<i64: 4, 24, 32>}, {pipeline_mode = #tpu.pipeline_mode<synchronous>, transform_indices = @transform_3, window_bounds = array<i64: 128, 128>}, {pipeline_mode = #tpu.pipeline_mode<synchronous>, transform_indices = @transform_4, window_bounds = array<i64: 1, 128>}, {pipeline_mode = #tpu.pipeline_mode<synchronous>, transform_indices = @transform_5, window_bounds = array<i64: 128, 128>}, {pipeline_mode = #tpu.pipeline_mode<synchronous>, transform_indices = @transform_6, window_bounds = array<i64: 1, 128>}, {pipeline_mode = #tpu.pipeline_mode<synchronous>, transform_indices = @transform_7, window_bounds = array<i64: 128, 128>}, {pipeline_mode = #tpu.pipeline_mode<synchronous>, transform_indices = @transform_8, window_bounds = array<i64: 1, 128>}, {transform_indices = @transform_9, window_bounds = array<i64: 24, 128>}, {transform_indices = @transform_10, window_bounds = array<i64: 4, 24, 128>}, {transform_indices = @transform_11, window_bounds = array<i64: 4, 24, 128>}]} {
    %cst = arith.constant 0.000000e+00 : f32
    %0 = vector.broadcast %cst : f32 to vector<216x96xf32>
    %c0 = arith.constant 0 : index
    %c32 = arith.constant 32 : index
    %1 = vector.load %arg13[%c0, %c32] : memref<216x128xf32, #tpu.memory_space<vmem>>, vector<216x96xf32>
    tpu.vector_store %arg13[%c0, %c32], %0 {strides = array<i32>} : memref<216x128xf32, #tpu.memory_space<vmem>>, vector<216x96xf32>,
    %c0_0 = arith.constant 0 : index
    %c0_1 = arith.constant 0 : index
    %2 = vector.load %arg1[%c0_0, %c0_1] : memref<24x32xf32, #tpu.memory_space<vmem>>, vector<24x32xf32>
    %c0_2 = arith.constant 0 : index
    %c0_3 = arith.constant 0 : index
    %3 = vector.load %arg13[%c0_2, %c0_3] : memref<216x128xf32, #tpu.memory_space<vmem>>, vector<24x32xf32>
    tpu.vector_store %arg13[%c0_2, %c0_3], %2 {strides = array<i32>} : memref<216x128xf32, #tpu.memory_space<vmem>>, vector<24x32xf32>,
    %c0_4 = arith.constant 0 : index
    %c0_5 = arith.constant 0 : index
    %c0_6 = arith.constant 0 : index
    %4 = vector.load %arg2[%c0_4, %c0_5, %c0_6] : memref<4x24x32xf32, #tpu.memory_space<vmem>>, vector<4x24x32xf32>
    %5 = vector.shape_cast %4 : vector<4x24x32xf32> to vector<96x32xf32>
    %c24 = arith.constant 24 : index
    %c0_7 = arith.constant 0 : index
    %6 = vector.load %arg13[%c24, %c0_7] : memref<216x128xf32, #tpu.memory_space<vmem>>, vector<96x32xf32>
    tpu.vector_store %arg13[%c24, %c0_7], %5 {strides = array<i32>} : memref<216x128xf32, #tpu.memory_space<vmem>>, vector<96x32xf32>,
    %c0_8 = arith.constant 0 : index
    %c0_9 = arith.constant 0 : index
    %c0_10 = arith.constant 0 : index
    %7 = vector.load %arg3[%c0_8, %c0_9, %c0_10] : memref<4x24x32xf32, #tpu.memory_space<vmem>>, vector<4x24x32xf32>
    %8 = vector.shape_cast %7 : vector<4x24x32xf32> to vector<96x32xf32>
    %c120 = arith.constant 120 : index
    %c0_11 = arith.constant 0 : index
    %9 = vector.load %arg13[%c120, %c0_11] : memref<216x128xf32, #tpu.memory_space<vmem>>, vector<96x32xf32>
    tpu.vector_store %arg13[%c120, %c0_11], %8 {strides = array<i32>} : memref<216x128xf32, #tpu.memory_space<vmem>>, vector<96x32xf32>,
    %c0_12 = arith.constant 0 : index
    %c0_13 = arith.constant 0 : index
    %10 = vector.load %arg4[%c0_12, %c0_13] : memref<128x128xf32, #tpu.memory_space<vmem>>, vector<128x128xf32>
    %c0_14 = arith.constant 0 : index
    %c0_15 = arith.constant 0 : index
    %11 = vector.load %arg5[%c0_14, %c0_15] : memref<1x128xf32, #tpu.memory_space<vmem>>, vector<1x128xf32>
    %c0_16 = arith.constant 0 : index
    %c0_17 = arith.constant 0 : index
    %12 = vector.load %arg13[%c0_16, %c0_17] : memref<216x128xf32, #tpu.memory_space<vmem>>, vector<216x128xf32>
    %cst_18 = arith.constant dense<0.000000e+00> : vector<216x128xf32>
    %13 = tpu.matmul %12, %10, %cst_18 {dimension_numbers = #tpu.dot_dimension_numbers<[1], [0], [0], [1], [0, 0, 1, 1], [], []>} : vector<216x128xf32>, vector<128x128xf32>, vector<216x128xf32> -> vector<216x128xf32>
    %14 = vector.extract_strided_slice %13 {offsets = [0, 0], sizes = [24, 128], strides = [1, 1]} : vector<216x128xf32> to vector<24x128xf32>
    %15 = vector.broadcast %11 : vector<1x128xf32> to vector<24x128xf32>
    %16 = arith.addf %14, %15 : vector<24x128xf32>
    %17 = vector.extract_strided_slice %13 {offsets = [24, 0], sizes = [96, 128], strides = [1, 1]} : vector<216x128xf32> to vector<96x128xf32>
    %18 = vector.extract_strided_slice %13 {offsets = [120, 0], sizes = [96, 128], strides = [1, 1]} : vector<216x128xf32> to vector<96x128xf32>
    %19 = math.tanh %16 : vector<24x128xf32>
    %20 = arith.mulf %19, %19 : vector<24x128xf32>
    %cst_19 = arith.constant 1.000000e+00 : f32
    %21 = vector.broadcast %cst_19 : f32 to vector<24x128xf32>
    %22 = arith.subf %21, %20 : vector<24x128xf32>
    %cst_20 = arith.constant -2.000000e+00 : f32
    %23 = vector.broadcast %cst_20 : f32 to vector<24x128xf32>
    %24 = arith.mulf %23, %19 : vector<24x128xf32>
    %25 = arith.mulf %24, %22 : vector<24x128xf32>
    %26 = vector.shape_cast %17 : vector<96x128xf32> to vector<4x24x128xf32>
    %27 = vector.shape_cast %18 : vector<96x128xf32> to vector<4x24x128xf32>
    %28 = vector.shape_cast %22 : vector<24x128xf32> to vector<1x24x128xf32>
    %29 = vector.broadcast %28 : vector<1x24x128xf32> to vector<4x24x128xf32>
    %30 = arith.mulf %29, %26 : vector<4x24x128xf32>
    %31 = vector.shape_cast %25 : vector<24x128xf32> to vector<1x24x128xf32>
    %32 = arith.mulf %26, %26 : vector<4x24x128xf32>
    %33 = vector.broadcast %31 : vector<1x24x128xf32> to vector<4x24x128xf32>
    %34 = arith.mulf %33, %32 : vector<4x24x128xf32>
    %35 = vector.broadcast %28 : vector<1x24x128xf32> to vector<4x24x128xf32>
    %36 = arith.mulf %27, %35 : vector<4x24x128xf32>
    %37 = arith.addf %34, %36 : vector<4x24x128xf32>
    %c0_21 = arith.constant 0 : index
    %c0_22 = arith.constant 0 : index
    %38 = vector.load %arg13[%c0_21, %c0_22] : memref<216x128xf32, #tpu.memory_space<vmem>>, vector<24x128xf32>
    tpu.vector_store %arg13[%c0_21, %c0_22], %19 {strides = array<i32>} : memref<216x128xf32, #tpu.memory_space<vmem>>, vector<24x128xf32>,
    %39 = vector.shape_cast %30 : vector<4x24x128xf32> to vector<96x128xf32>
    %c24_23 = arith.constant 24 : index
    %c0_24 = arith.constant 0 : index
    %40 = vector.load %arg13[%c24_23, %c0_24] : memref<216x128xf32, #tpu.memory_space<vmem>>, vector<96x128xf32>
    tpu.vector_store %arg13[%c24_23, %c0_24], %39 {strides = array<i32>} : memref<216x128xf32, #tpu.memory_space<vmem>>, vector<96x128xf32>,
    %41 = vector.shape_cast %37 : vector<4x24x128xf32> to vector<96x128xf32>
    %c120_25 = arith.constant 120 : index
    %c0_26 = arith.constant 0 : index
    %42 = vector.load %arg13[%c120_25, %c0_26] : memref<216x128xf32, #tpu.memory_space<vmem>>, vector<96x128xf32>
    tpu.vector_store %arg13[%c120_25, %c0_26], %41 {strides = array<i32>} : memref<216x128xf32, #tpu.memory_space<vmem>>, vector<96x128xf32>,
    %c0_27 = arith.constant 0 : index
    %c0_28 = arith.constant 0 : index
    %43 = vector.load %arg6[%c0_27, %c0_28] : memref<128x128xf32, #tpu.memory_space<vmem>>, vector<128x128xf32>
    %c0_29 = arith.constant 0 : index
    %c0_30 = arith.constant 0 : index
    %44 = vector.load %arg7[%c0_29, %c0_30] : memref<1x128xf32, #tpu.memory_space<vmem>>, vector<1x128xf32>
    %c0_31 = arith.constant 0 : index
    %c0_32 = arith.constant 0 : index
    %45 = vector.load %arg13[%c0_31, %c0_32] : memref<216x128xf32, #tpu.memory_space<vmem>>, vector<216x128xf32>
    %cst_33 = arith.constant dense<0.000000e+00> : vector<216x128xf32>
    %46 = tpu.matmul %45, %43, %cst_33 {dimension_numbers = #tpu.dot_dimension_numbers<[1], [0], [0], [1], [0, 0, 1, 1], [], []>} : vector<216x128xf32>, vector<128x128xf32>, vector<216x128xf32> -> vector<216x128xf32>
    %47 = vector.extract_strided_slice %46 {offsets = [0, 0], sizes = [24, 128], strides = [1, 1]} : vector<216x128xf32> to vector<24x128xf32>
    %48 = vector.broadcast %44 : vector<1x128xf32> to vector<24x128xf32>
    %49 = arith.addf %47, %48 : vector<24x128xf32>
    %50 = vector.extract_strided_slice %46 {offsets = [24, 0], sizes = [96, 128], strides = [1, 1]} : vector<216x128xf32> to vector<96x128xf32>
    %51 = vector.extract_strided_slice %46 {offsets = [120, 0], sizes = [96, 128], strides = [1, 1]} : vector<216x128xf32> to vector<96x128xf32>
    %cst_34 = arith.constant 0.000000e+00 : f32
    %52 = vector.broadcast %cst_34 : f32 to vector<24x128xf32>
    %53 = arith.subf %52, %49 : vector<24x128xf32>
    %54 = math.exp %53 : vector<24x128xf32>
    %cst_35 = arith.constant 1.000000e+00 : f32
    %55 = vector.broadcast %cst_35 : f32 to vector<24x128xf32>
    %56 = arith.addf %55, %54 : vector<24x128xf32>
    %cst_36 = arith.constant 1.000000e+00 : f32
    %57 = vector.broadcast %cst_36 : f32 to vector<24x128xf32>
    %58 = arith.divf %57, %56 : vector<24x128xf32>
    %cst_37 = arith.constant 1.000000e+00 : f32
    %59 = vector.broadcast %cst_37 : f32 to vector<24x128xf32>
    %60 = arith.subf %59, %58 : vector<24x128xf32>
    %61 = arith.mulf %58, %60 : vector<24x128xf32>
    %cst_38 = arith.constant 2.000000e+00 : f32
    %62 = vector.broadcast %cst_38 : f32 to vector<24x128xf32>
    %63 = arith.mulf %62, %58 : vector<24x128xf32>
    %cst_39 = arith.constant 1.000000e+00 : f32
    %64 = vector.broadcast %cst_39 : f32 to vector<24x128xf32>
    %65 = arith.subf %64, %63 : vector<24x128xf32>
    %66 = arith.mulf %65, %61 : vector<24x128xf32>
    %67 = vector.shape_cast %50 : vector<96x128xf32> to vector<4x24x128xf32>
    %68 = vector.shape_cast %51 : vector<96x128xf32> to vector<4x24x128xf32>
    %69 = vector.shape_cast %61 : vector<24x128xf32> to vector<1x24x128xf32>
    %70 = vector.broadcast %69 : vector<1x24x128xf32> to vector<4x24x128xf32>
    %71 = arith.mulf %70, %67 : vector<4x24x128xf32>
    %72 = vector.shape_cast %66 : vector<24x128xf32> to vector<1x24x128xf32>
    %73 = arith.mulf %67, %67 : vector<4x24x128xf32>
    %74 = vector.broadcast %72 : vector<1x24x128xf32> to vector<4x24x128xf32>
    %75 = arith.mulf %74, %73 : vector<4x24x128xf32>
    %76 = vector.broadcast %69 : vector<1x24x128xf32> to vector<4x24x128xf32>
    %77 = arith.mulf %68, %76 : vector<4x24x128xf32>
    %78 = arith.addf %75, %77 : vector<4x24x128xf32>
    %c0_40 = arith.constant 0 : index
    %c0_41 = arith.constant 0 : index
    %79 = vector.load %arg13[%c0_40, %c0_41] : memref<216x128xf32, #tpu.memory_space<vmem>>, vector<24x128xf32>
    tpu.vector_store %arg13[%c0_40, %c0_41], %58 {strides = array<i32>} : memref<216x128xf32, #tpu.memory_space<vmem>>, vector<24x128xf32>,
    %80 = vector.shape_cast %71 : vector<4x24x128xf32> to vector<96x128xf32>
    %c24_42 = arith.constant 24 : index
    %c0_43 = arith.constant 0 : index
    %81 = vector.load %arg13[%c24_42, %c0_43] : memref<216x128xf32, #tpu.memory_space<vmem>>, vector<96x128xf32>
    tpu.vector_store %arg13[%c24_42, %c0_43], %80 {strides = array<i32>} : memref<216x128xf32, #tpu.memory_space<vmem>>, vector<96x128xf32>,
    %82 = vector.shape_cast %78 : vector<4x24x128xf32> to vector<96x128xf32>
    %c120_44 = arith.constant 120 : index
    %c0_45 = arith.constant 0 : index
    %83 = vector.load %arg13[%c120_44, %c0_45] : memref<216x128xf32, #tpu.memory_space<vmem>>, vector<96x128xf32>
    tpu.vector_store %arg13[%c120_44, %c0_45], %82 {strides = array<i32>} : memref<216x128xf32, #tpu.memory_space<vmem>>, vector<96x128xf32>,
    %c0_46 = arith.constant 0 : index
    %c0_47 = arith.constant 0 : index
    %84 = vector.load %arg8[%c0_46, %c0_47] : memref<128x128xf32, #tpu.memory_space<vmem>>, vector<128x128xf32>
    %c0_48 = arith.constant 0 : index
    %c0_49 = arith.constant 0 : index
    %85 = vector.load %arg9[%c0_48, %c0_49] : memref<1x128xf32, #tpu.memory_space<vmem>>, vector<1x128xf32>
    %c0_50 = arith.constant 0 : index
    %c0_51 = arith.constant 0 : index
    %86 = vector.load %arg13[%c0_50, %c0_51] : memref<216x128xf32, #tpu.memory_space<vmem>>, vector<216x128xf32>
    %cst_52 = arith.constant dense<0.000000e+00> : vector<216x128xf32>
    %87 = tpu.matmul %86, %84, %cst_52 {dimension_numbers = #tpu.dot_dimension_numbers<[1], [0], [0], [1], [0, 0, 1, 1], [], []>} : vector<216x128xf32>, vector<128x128xf32>, vector<216x128xf32> -> vector<216x128xf32>
    %88 = vector.extract_strided_slice %87 {offsets = [0, 0], sizes = [24, 128], strides = [1, 1]} : vector<216x128xf32> to vector<24x128xf32>
    %89 = vector.broadcast %85 : vector<1x128xf32> to vector<24x128xf32>
    %90 = arith.addf %88, %89 : vector<24x128xf32>
    %91 = vector.extract_strided_slice %87 {offsets = [24, 0], sizes = [96, 128], strides = [1, 1]} : vector<216x128xf32> to vector<96x128xf32>
    %92 = vector.extract_strided_slice %87 {offsets = [120, 0], sizes = [96, 128], strides = [1, 1]} : vector<216x128xf32> to vector<96x128xf32>
    %93 = math.sin %90 : vector<24x128xf32>
    %94 = math.cos %90 : vector<24x128xf32>
    %95 = math.sin %90 : vector<24x128xf32>
    %cst_53 = arith.constant 0.000000e+00 : f32
    %96 = vector.broadcast %cst_53 : f32 to vector<24x128xf32>
    %97 = arith.subf %96, %95 : vector<24x128xf32>
    %98 = vector.shape_cast %91 : vector<96x128xf32> to vector<4x24x128xf32>
    %99 = vector.shape_cast %92 : vector<96x128xf32> to vector<4x24x128xf32>
    %100 = vector.shape_cast %94 : vector<24x128xf32> to vector<1x24x128xf32>
    %101 = vector.broadcast %100 : vector<1x24x128xf32> to vector<4x24x128xf32>
    %102 = arith.mulf %101, %98 : vector<4x24x128xf32>
    %103 = vector.shape_cast %97 : vector<24x128xf32> to vector<1x24x128xf32>
    %104 = arith.mulf %98, %98 : vector<4x24x128xf32>
    %105 = vector.broadcast %103 : vector<1x24x128xf32> to vector<4x24x128xf32>
    %106 = arith.mulf %105, %104 : vector<4x24x128xf32>
    %107 = vector.broadcast %100 : vector<1x24x128xf32> to vector<4x24x128xf32>
    %108 = arith.mulf %99, %107 : vector<4x24x128xf32>
    %109 = arith.addf %106, %108 : vector<4x24x128xf32>
    %c0_54 = arith.constant 0 : index
    %c0_55 = arith.constant 0 : index
    %110 = vector.load %arg13[%c0_54, %c0_55] : memref<216x128xf32, #tpu.memory_space<vmem>>, vector<24x128xf32>
    tpu.vector_store %arg13[%c0_54, %c0_55], %93 {strides = array<i32>} : memref<216x128xf32, #tpu.memory_space<vmem>>, vector<24x128xf32>,
    %111 = vector.shape_cast %102 : vector<4x24x128xf32> to vector<96x128xf32>
    %c24_56 = arith.constant 24 : index
    %c0_57 = arith.constant 0 : index
    %112 = vector.load %arg13[%c24_56, %c0_57] : memref<216x128xf32, #tpu.memory_space<vmem>>, vector<96x128xf32>
    tpu.vector_store %arg13[%c24_56, %c0_57], %111 {strides = array<i32>} : memref<216x128xf32, #tpu.memory_space<vmem>>, vector<96x128xf32>,
    %113 = vector.shape_cast %109 : vector<4x24x128xf32> to vector<96x128xf32>
    %c120_58 = arith.constant 120 : index
    %c0_59 = arith.constant 0 : index
    %114 = vector.load %arg13[%c120_58, %c0_59] : memref<216x128xf32, #tpu.memory_space<vmem>>, vector<96x128xf32>
    tpu.vector_store %arg13[%c120_58, %c0_59], %113 {strides = array<i32>} : memref<216x128xf32, #tpu.memory_space<vmem>>, vector<96x128xf32>,
    %c0_60 = arith.constant 0 : index
    %c0_61 = arith.constant 0 : index
    %115 = vector.load %arg13[%c0_60, %c0_61] : memref<216x128xf32, #tpu.memory_space<vmem>>, vector<24x32xf32>
    %c0_62 = arith.constant 0 : index
    %c0_63 = arith.constant 0 : index
    %116 = vector.load %arg1[%c0_62, %c0_63] : memref<24x32xf32, #tpu.memory_space<vmem>>, vector<24x32xf32>
    %117 = arith.addf %115, %116 : vector<24x32xf32>
    %c0_64 = arith.constant 0 : index
    %c0_65 = arith.constant 0 : index
    %118 = vector.load %arg13[%c0_64, %c0_65] : memref<216x128xf32, #tpu.memory_space<vmem>>, vector<24x32xf32>
    tpu.vector_store %arg13[%c0_64, %c0_65], %117 {strides = array<i32>} : memref<216x128xf32, #tpu.memory_space<vmem>>, vector<24x32xf32>,
    %c24_66 = arith.constant 24 : index
    %c0_67 = arith.constant 0 : index
    %119 = vector.load %arg13[%c24_66, %c0_67] : memref<216x128xf32, #tpu.memory_space<vmem>>, vector<96x32xf32>
    %c0_68 = arith.constant 0 : index
    %c0_69 = arith.constant 0 : index
    %c0_70 = arith.constant 0 : index
    %120 = vector.load %arg2[%c0_68, %c0_69, %c0_70] : memref<4x24x32xf32, #tpu.memory_space<vmem>>, vector<4x24x32xf32>
    %121 = vector.shape_cast %120 : vector<4x24x32xf32> to vector<96x32xf32>
    %122 = arith.addf %119, %121 : vector<96x32xf32>
    %c24_71 = arith.constant 24 : index
    %c0_72 = arith.constant 0 : index
    %123 = vector.load %arg13[%c24_71, %c0_72] : memref<216x128xf32, #tpu.memory_space<vmem>>, vector<96x32xf32>
    tpu.vector_store %arg13[%c24_71, %c0_72], %122 {strides = array<i32>} : memref<216x128xf32, #tpu.memory_space<vmem>>, vector<96x32xf32>,
    %c120_73 = arith.constant 120 : index
    %c0_74 = arith.constant 0 : index
    %124 = vector.load %arg13[%c120_73, %c0_74] : memref<216x128xf32, #tpu.memory_space<vmem>>, vector<96x32xf32>
    %c0_75 = arith.constant 0 : index
    %c0_76 = arith.constant 0 : index
    %c0_77 = arith.constant 0 : index
    %125 = vector.load %arg3[%c0_75, %c0_76, %c0_77] : memref<4x24x32xf32, #tpu.memory_space<vmem>>, vector<4x24x32xf32>
    %126 = vector.shape_cast %125 : vector<4x24x32xf32> to vector<96x32xf32>
    %127 = arith.addf %124, %126 : vector<96x32xf32>
    %c120_78 = arith.constant 120 : index
    %c0_79 = arith.constant 0 : index
    %128 = vector.load %arg13[%c120_78, %c0_79] : memref<216x128xf32, #tpu.memory_space<vmem>>, vector<96x32xf32>
    tpu.vector_store %arg13[%c120_78, %c0_79], %127 {strides = array<i32>} : memref<216x128xf32, #tpu.memory_space<vmem>>, vector<96x32xf32>,
    %c0_80 = arith.constant 0 : index
    %c0_81 = arith.constant 0 : index
    %129 = vector.load %arg13[%c0_80, %c0_81] : memref<216x128xf32, #tpu.memory_space<vmem>>, vector<24x128xf32>
    %c0_82 = arith.constant 0 : index
    %c0_83 = arith.constant 0 : index
    %130 = vector.load %arg10[%c0_82, %c0_83] : memref<24x128xf32, #tpu.memory_space<vmem>>, vector<24x128xf32>
    tpu.vector_store %arg10[%c0_82, %c0_83], %129 {strides = array<i32>} : memref<24x128xf32, #tpu.memory_space<vmem>>, vector<24x128xf32>,
    %c24_84 = arith.constant 24 : index
    %c0_85 = arith.constant 0 : index
    %131 = vector.load %arg13[%c24_84, %c0_85] : memref<216x128xf32, #tpu.memory_space<vmem>>, vector<96x128xf32>
    %132 = vector.shape_cast %131 : vector<96x128xf32> to vector<4x24x128xf32>
    %c0_86 = arith.constant 0 : index
    %c0_87 = arith.constant 0 : index
    %c0_88 = arith.constant 0 : index
    %133 = vector.load %arg11[%c0_86, %c0_87, %c0_88] : memref<4x24x128xf32, #tpu.memory_space<vmem>>, vector<4x24x128xf32>
    tpu.vector_store %arg11[%c0_86, %c0_87, %c0_88], %132 {strides = array<i32>} : memref<4x24x128xf32, #tpu.memory_space<vmem>>, vector<4x24x128xf32>,
    %c120_89 = arith.constant 120 : index
    %c0_90 = arith.constant 0 : index
    %134 = vector.load %arg13[%c120_89, %c0_90] : memref<216x128xf32, #tpu.memory_space<vmem>>, vector<96x128xf32>
    %135 = vector.shape_cast %134 : vector<96x128xf32> to vector<4x24x128xf32>
    %c0_91 = arith.constant 0 : index
    %c0_92 = arith.constant 0 : index
    %c0_93 = arith.constant 0 : index
    %136 = vector.load %arg12[%c0_91, %c0_92, %c0_93] : memref<4x24x128xf32, #tpu.memory_space<vmem>>, vector<4x24x128xf32>
    tpu.vector_store %arg12[%c0_91, %c0_92, %c0_93], %135 {strides = array<i32>} : memref<4x24x128xf32, #tpu.memory_space<vmem>>, vector<4x24x128xf32>,
    return
  }
  func.func @transform_0(%arg0: i32) -> (i32, i32) {
    %c0_i32 = arith.constant 0 : i32
    %c0_i32_0 = arith.constant 0 : i32
    return %arg0, %c0_i32 : i32, i32
  }
  func.func @transform_1(%arg0: i32) -> (i32, i32, i32) {
    %c0_i32 = arith.constant 0 : i32
    %c0_i32_0 = arith.constant 0 : i32
    %c0_i32_1 = arith.constant 0 : i32
    return %c0_i32, %arg0, %c0_i32_0 : i32, i32, i32
  }
  func.func @transform_2(%arg0: i32) -> (i32, i32, i32) {
    %c0_i32 = arith.constant 0 : i32
    %c0_i32_0 = arith.constant 0 : i32
    %c0_i32_1 = arith.constant 0 : i32
    return %c0_i32, %arg0, %c0_i32_0 : i32, i32, i32
  }
  func.func @transform_3(%arg0: i32) -> (i32, i32) {
    %c0_i32 = arith.constant 0 : i32
    %c0_i32_0 = arith.constant 0 : i32
    %c0_i32_1 = arith.constant 0 : i32
    return %c0_i32, %c0_i32_0 : i32, i32
  }
  func.func @transform_4(%arg0: i32) -> (i32, i32) {
    %c0_i32 = arith.constant 0 : i32
    %c0_i32_0 = arith.constant 0 : i32
    %c0_i32_1 = arith.constant 0 : i32
    return %c0_i32, %c0_i32_0 : i32, i32
  }
  func.func @transform_5(%arg0: i32) -> (i32, i32) {
    %c0_i32 = arith.constant 0 : i32
    %c0_i32_0 = arith.constant 0 : i32
    %c0_i32_1 = arith.constant 0 : i32
    return %c0_i32, %c0_i32_0 : i32, i32
  }
  func.func @transform_6(%arg0: i32) -> (i32, i32) {
    %c0_i32 = arith.constant 0 : i32
    %c0_i32_0 = arith.constant 0 : i32
    %c0_i32_1 = arith.constant 0 : i32
    return %c0_i32, %c0_i32_0 : i32, i32
  }
  func.func @transform_7(%arg0: i32) -> (i32, i32) {
    %c0_i32 = arith.constant 0 : i32
    %c0_i32_0 = arith.constant 0 : i32
    %c0_i32_1 = arith.constant 0 : i32
    return %c0_i32, %c0_i32_0 : i32, i32
  }
  func.func @transform_8(%arg0: i32) -> (i32, i32) {
    %c0_i32 = arith.constant 0 : i32
    %c0_i32_0 = arith.constant 0 : i32
    %c0_i32_1 = arith.constant 0 : i32
    return %c0_i32, %c0_i32_0 : i32, i32
  }
  func.func @transform_9(%arg0: i32) -> (i32, i32) {
    %c0_i32 = arith.constant 0 : i32
    %c0_i32_0 = arith.constant 0 : i32
    return %arg0, %c0_i32 : i32, i32
  }
  func.func @transform_10(%arg0: i32) -> (i32, i32, i32) {
    %c0_i32 = arith.constant 0 : i32
    %c0_i32_0 = arith.constant 0 : i32
    %c0_i32_1 = arith.constant 0 : i32
    return %c0_i32, %arg0, %c0_i32_0 : i32, i32, i32
  }
  func.func @transform_11(%arg0: i32) -> (i32, i32, i32) {
    %c0_i32 = arith.constant 0 : i32
    %c0_i32_0 = arith.constant 0 : i32
    %c0_i32_1 = arith.constant 0 : i32
    return %c0_i32, %arg0, %c0_i32_0 : i32, i32, i32
  }
}

</mosaic_0001>

<bundles_post_ra>
// kernel: tpu_custom_call.1
= control target key start
LH: loop header
LB: loop body
LE: loop exit
PB: predicated region body
PF: predicated region fallthrough
CT: control target
= control target key end

     0   :  { %s4992_s0 = inlined_call_operand.vmem [shape: f32[48,32], index: 0, kind: input, shape index: {}]   ;;  %s4993_s1 = inlined_call_operand.vmem [shape: f32[4,48,32], index: 1, kind: input, shape index: {}]   ;;  %s4994_s2 = inlined_call_operand.vmem [shape: f32[4,48,32], index: 2, kind: input, shape index: {}]   ;;  %s4995_s3 = inlined_call_operand.vmem [shape: f32[128,128], index: 3, kind: input, shape index: {}]   ;;  %s4996_s4 = inlined_call_operand.vmem [shape: f32[1,128], index: 4, kind: input, shape index: {}]   ;;  %s4997_s5 = inlined_call_operand.vmem [shape: f32[128,128], index: 5, kind: input, shape index: {}]   ;;  %s4998_s6 = inlined_call_operand.vmem [shape: f32[1,128], index: 6, kind: input, shape index: {}]   ;;  %s4999_s7 = inlined_call_operand.vmem [shape: f32[128,128], index: 7, kind: input, shape index: {}]   ;;  %s5000_s8 = inlined_call_operand.vmem [shape: f32[1,128], index: 8, kind: input, shape index: {}]   ;;  %s5001_s9 = inlined_call_operand.hbm [shape: f32[48,128], index: 9, kind: output, shape index: {0}]   ;;  %s5002_s10 = inlined_call_operand.hbm [shape: f32[4,48,128], index: 10, kind: output, shape index: {1}]   ;;  %s5003_s11 = inlined_call_operand.hbm [shape: f32[4,48,128], index: 11, kind: output, shape index: {2}]  }
   0x1   :  { %5005 = sst [smem:[#allocation17_spill]] %s4992_s0 }
   0x2   :  { %5006 = sst [smem:[#allocation18_spill]] %s4993_s1 }
   0x3   :  { %5007 = sst [smem:[#allocation19_spill]] %s4994_s2 }
   0x4   :  { %5008 = sst [smem:[#allocation20_spill]] %s4995_s3 }
   0x5   :  { %17 = vsyncpa [#allocation6], 0 }
   0x6   :  { %19 = vsyncpa [#allocation6 + $0x1], 0 }
   0x7   :  { %20 = vsyncpa [#allocation8], 0 }
   0x8   :  { %22 = vsyncpa [#allocation8 + $0x1], 0  ;;  %s3704_s17 = smov 0   ;;  %s3706_s18 = smov 0  }
   0x9   :  { %s3708_s19 = smov 0   ;;  %s3710_s20 = smov 0  }
   0xa LB: > { %s3725_s21 = sadd.s32 4294967295, %s3616_s20   ;;  %s5004_s22 = sadd.s32 4294967294, %s3616_s20   ;;  %s3616_s20 = sphi %s3710_s20, %s5029_s20   ;;  %s3612_s19 = sphi %s3708_s19, %s5028_s19   ;;  %s3608_s18 = sphi %s3706_s18, %s5027_s18   ;;  %s3604_s17 = sphi %s3704_s17, %s5026_s17  }
   0xb   : > { %s3729_s23 = sadd.s32 1, %s3616_s20   ;;  %s61_s24 = sadd.s32 1, %s3612_s19 }
   0xc   : > { %s58_s25 = ssub.s32 %s3616_s20, %s3729_s23  ;;  %p68_p0 = scmp.ne.s32.totalorder %s3612_s19, %s3608_s18 }
   0xd   : > { %p59_p1 = scmp.eq.s32.totalorder %s58_s25, 0  ;;  %p69_p2 = scmp.eq.s32.totalorder %s3616_s20, 0 }
   0xe   : > { %p250_p3 = scmp.eq.s32.totalorder %s3725_s21, 1  ;;  %p255_p4 = scmp.ne.s32.totalorder %s3608_s18, %s3604_s17 }
   0xf   : > { %s3741_s26 = scalar_select %p59_p1, %s3612_s19, %s61_s24  }
  0x10   : > { %p3743_p5 = por %p69_p2, %p68_p0  ;;  %p3747_p6 = por %p250_p3, %p68_p0 }
  0x11   : > { %5009 = sst [smem:[#allocation16_spill]] %s3741_s26  ;;  %p256_p7 = scmp.eq.s32.totalorder %s5004_s22, 1 }
  0x12   : > { %p2820_p9 = scmp.ge.s32.totalorder %s3616_s20, 2 }
  0x13   : > { %p3753_p8 = por %p256_p7, %p255_p4 }
  0x14   : > { %342 = sbr.rel (%p2820_p9) target bundleno = 57 (0x39), region = 40 }
  0x1b   : > { %354 = sbr.rel (!%p3743_p5) target bundleno = 42 (0x2a), region = 48  ;;  %s356_s30 = sand.u32 (%p3743_p5), 1, %s3612_s19  }
  0x1c   : > { %s2857_s12 = smul.u32 (%p3743_p5), 24, %s3616_s20  ;;  %s5013_s1 = sld [smem:[#allocation18_spill]] (%p3743_p5) }
  0x1d   : > { %s3418_s13 = smul.u32 (%p3743_p5), 96, %s356_s30 }
  0x1f   : > { %s358_s24 = scalar_lea.vmem (%p3743_p5), [#allocation3], %s3418_s13 }
  0x22   : > { %s361_s16 = scalar_lea.vmem %s5013_s1, %s2857_s12 }
  0x23   : > { %v411_v0 = vld [vmem:[%s361_s16] sm:$0xff]  ;;  %v413_v1 = vld [vmem:[%s361_s16 + $0x8] sm:$0xff]  ;;  %v415_v2 = vld [vmem:[%s361_s16 + $0x10] sm:$0xff] }
  0x24   : > { %412 = vst [vmem:[%s358_s24] sm:$0xff] %v411_v0  ;;  %414 = vst [vmem:[%s358_s24 + $0x8] sm:$0xff] %v413_v1  ;;  %v417_v3 = vld [vmem:[%s361_s16 + $0x30] sm:$0xff]  ;;  %v419_v4 = vld [vmem:[%s361_s16 + $0x38] sm:$0xff] }
  0x25   : > { %416 = vst [vmem:[%s358_s24 + $0x10] sm:$0xff] %v415_v2  ;;  %v421_v5 = vld [vmem:[%s361_s16 + $0x40] sm:$0xff]  ;;  %418 = vst [vmem:[%s358_s24 + $0x18] sm:$0xff] %v417_v3  ;;  %v425_v7 = vld [vmem:[%s361_s16 + $0x68] sm:$0xff] }
  0x26   : > { %420 = vst [vmem:[%s358_s24 + $0x20] sm:$0xff] %v419_v4  ;;  %422 = vst [vmem:[%s358_s24 + $0x28] sm:$0xff] %v421_v5  ;;  %v423_v6 = vld [vmem:[%s361_s16 + $0x60] sm:$0xff]  ;;  %v427_v8 = vld [vmem:[%s361_s16 + $0x70] sm:$0xff] }
  0x27   : > { %424 = vst [vmem:[%s358_s24 + $0x30] sm:$0xff] %v423_v6  ;;  %426 = vst [vmem:[%s358_s24 + $0x38] sm:$0xff] %v425_v7  ;;  %v429_v9 = vld [vmem:[%s361_s16 + $0x90] sm:$0xff]  ;;  %v431_v10 = vld [vmem:[%s361_s16 + $0x98] sm:$0xff] }
  0x28   : > { %428 = vst [vmem:[%s358_s24 + $0x40] sm:$0xff] %v427_v8  ;;  %v433_v11 = vld [vmem:[%s361_s16 + $0xa0] sm:$0xff]  ;;  %430 = vst [vmem:[%s358_s24 + $0x48] sm:$0xff] %v429_v9 }
  0x29   : > { %432 = vst [vmem:[%s358_s24 + $0x50] sm:$0xff] %v431_v10  ;;  %434 = vst [vmem:[%s358_s24 + $0x58] sm:$0xff] %v433_v11 }
  0x2a PF: > { %440 = sbr.rel (!%p3743_p5) target bundleno = 57 (0x39), region = 86  ;;  %s442_s25 = sand.u32 (%p3743_p5), 1, %s3612_s19  }
  0x2b   : > { %s2858_s30 = smul.u32 (%p3743_p5), 24, %s3616_s20  ;;  %s5014_s2 = sld [smem:[#allocation19_spill]] (%p3743_p5) }
  0x2c   : > { %s3419_s12 = smul.u32 (%p3743_p5), 96, %s442_s25 }
  0x2e   : > { %s444_s16 = scalar_lea.vmem (%p3743_p5), [#allocation4], %s3419_s12 }
  0x31   : > { %s447_s15 = scalar_lea.vmem %s5014_s2, %s2858_s30 }
  0x32   : > { %v497_v12 = vld [vmem:[%s447_s15] sm:$0xff]  ;;  %v499_v13 = vld [vmem:[%s447_s15 + $0x8] sm:$0xff]  ;;  %v501_v14 = vld [vmem:[%s447_s15 + $0x10] sm:$0xff] }
  0x33   : > { %498 = vst [vmem:[%s444_s16] sm:$0xff] %v497_v12  ;;  %500 = vst [vmem:[%s444_s16 + $0x8] sm:$0xff] %v499_v13  ;;  %v503_v15 = vld [vmem:[%s447_s15 + $0x30] sm:$0xff]  ;;  %v505_v16 = vld [vmem:[%s447_s15 + $0x38] sm:$0xff] }
  0x34   : > { %502 = vst [vmem:[%s444_s16 + $0x10] sm:$0xff] %v501_v14  ;;  %v507_v17 = vld [vmem:[%s447_s15 + $0x40] sm:$0xff]  ;;  %504 = vst [vmem:[%s444_s16 + $0x18] sm:$0xff] %v503_v15  ;;  %v511_v19 = vld [vmem:[%s447_s15 + $0x68] sm:$0xff] }
  0x35   : > { %506 = vst [vmem:[%s444_s16 + $0x20] sm:$0xff] %v505_v16  ;;  %508 = vst [vmem:[%s444_s16 + $0x28] sm:$0xff] %v507_v17  ;;  %v509_v18 = vld [vmem:[%s447_s15 + $0x60] sm:$0xff]  ;;  %v513_v20 = vld [vmem:[%s447_s15 + $0x70] sm:$0xff] }
  0x36   : > { %510 = vst [vmem:[%s444_s16 + $0x30] sm:$0xff] %v509_v18  ;;  %512 = vst [vmem:[%s444_s16 + $0x38] sm:$0xff] %v511_v19  ;;  %v515_v21 = vld [vmem:[%s447_s15 + $0x90] sm:$0xff]  ;;  %v517_v22 = vld [vmem:[%s447_s15 + $0x98] sm:$0xff] }
  0x37   : > { %514 = vst [vmem:[%s444_s16 + $0x40] sm:$0xff] %v513_v20  ;;  %v519_v23 = vld [vmem:[%s447_s15 + $0xa0] sm:$0xff]  ;;  %516 = vst [vmem:[%s444_s16 + $0x48] sm:$0xff] %v515_v21 }
  0x38   : > { %518 = vst [vmem:[%s444_s16 + $0x50] sm:$0xff] %v517_v22  ;;  %520 = vst [vmem:[%s444_s16 + $0x58] sm:$0xff] %v519_v23 }
  0x39 PF: > { %p2823_p10 = scmp.ge.s32.totalorder %s3616_s20, 1  ;;  %p525_p11 = scmp.lt.s32.totalorder %s3616_s20, 3 }
  0x3b   : > { %p526_p12 = pnand %p2823_p10, %p525_p11 }
  0x3c   : > { %s5015_s3 = sld [smem:[#allocation20_spill]] (!%p526_p12)  ;;  %v3618_v27 = vmov (!%p526_p12), 0.0|0.0   ;;  %s597_s16 = smul.u32 (!%p526_p12), 3, %s3725_s21  ;;  %vm608_vm0 = vcmask (!%p526_p12), 1047808   ;;  %vm3619_vm1 = vmmov (!%p526_p12), 0   ;;  %v3620_v30 = vmov (!%p526_p12), 0.0  }
  0x3d   : > { %529 = sbr.rel (%p526_p12) target bundleno = 947 (0x3b3), region = 124  ;;  %3330 = vmatprep.subr.bf16.mxu0 (!%p526_p12), %v3618_v27  ;;  %3402 = vmatprep.subr.bf16.mxu1 (!%p526_p12), %v3618_v27  ;;  %609 = vst.msk [vmem:[#allocation2] sm:$0xff] (!%p526_p12), %vm608_vm0, %v3620_v30  ;;  %610 = vst.msk [vmem:[#allocation2 + $0x8] sm:$0xff] (!%p526_p12), %vm608_vm0, %v3620_v30  ;;  %s3850_s27 = sand.u32 (!%p526_p12), 1, %s3608_s18   ;;  %vm639_vm2 = vcmask (!%p526_p12), 261120   ;;  %v1046_v13 = vld [vmem:[%s4997_s5] sm:$0xff] (!%p526_p12) }
  0x3e   : > { %3023 = vmatprep.mubr.msk.f32.mxu0 (!%p526_p12), %vm3619_vm1, %v3620_v30  ;;  %3065 = vmatprep.mubr.msk.f32.mxu1 (!%p526_p12), %vm3619_vm1, %v3620_v30  ;;  %611 = vst.msk [vmem:[#allocation2 + $0x10] sm:$0xff] (!%p526_p12), %vm608_vm0, %v3620_v30  ;;  %612 = vst.msk [vmem:[#allocation2 + $0x18] sm:$0xff] (!%p526_p12), %vm608_vm0, %v3620_v30  ;;  %p598_p13 = scmp.lt.s32.totalorder (!%p526_p12), %s597_s16, 5  ;;  %s3855_s24 = smul.u32 (!%p526_p12), 96, %s3850_s27  ;;  %v1047_v14 = vld [vmem:[%s4997_s5 + $0x8] sm:$0xff] (!%p526_p12)  ;;  %v1048_v18 = vld [vmem:[%s4997_s5 + $0x10] sm:$0xff] (!%p526_p12) }
  0x3f   : > { %613 = vst.msk [vmem:[#allocation2 + $0x20] sm:$0xff] (!%p526_p12), %vm608_vm0, %v3620_v30  ;;  %614 = vst.msk [vmem:[#allocation2 + $0x28] sm:$0xff] (!%p526_p12), %vm608_vm0, %v3620_v30  ;;  %s5016_s0 = sld [smem:[#allocation17_spill]] (!%p526_p12)  ;;  %v3355_v17 = vpack.c.bf16 (!%p526_p12), %v1047_v14, %v1046_v13  ;;  %v1049_v19 = vld [vmem:[%s4997_s5 + $0x18] sm:$0xff] (!%p526_p12)  ;;  %v1050_v23 = vld [vmem:[%s4997_s5 + $0x20] sm:$0xff] (!%p526_p12)  ;;  %s3421_s14 = smul.u32 (!%p526_p12), 24, %s3850_s27 }
  0x40   : > { %615 = vst.msk [vmem:[#allocation2 + $0x30] sm:$0xff] (!%p526_p12), %vm608_vm0, %v3620_v30  ;;  %616 = vst.msk [vmem:[#allocation2 + $0x38] sm:$0xff] (!%p526_p12), %vm608_vm0, %v3620_v30  ;;  %s3874_s30 = scalar_lea.vmem (!%p526_p12), [#allocation3], %s3855_s24  ;;  %s3878_s12 = scalar_lea.vmem (!%p526_p12), [#allocation4], %s3855_s24  ;;  %v3358_v22 = vpack.c.bf16 (!%p526_p12), %v1049_v19, %v1048_v18 }
  0x41   : > { %617 = vst.msk [vmem:[#allocation2 + $0x40] sm:$0xff] (!%p526_p12), %vm608_vm0, %v3620_v30  ;;  %618 = vst.msk [vmem:[#allocation2 + $0x48] sm:$0xff] (!%p526_p12), %vm608_vm0, %v3620_v30  ;;  %v654_v37 = vld [vmem:[%s3874_s30 + $0x58] sm:$0xff] (!%p526_p12)  ;;  %v667_v38 = vld [vmem:[%s3878_s12] sm:$0xff] (!%p526_p12)  ;;  %s4775_s2 = scalar_lea.vmem (!%p526_p12), [#allocation7], %s3855_s24  ;;  %s3627_s1 = smov (!%p526_p12), [#allocation5]  }
  0x42   : > { %v691_v24 = vld [vmem:[%s5015_s3] sm:$0xff] (!%p526_p12)  ;;  %v692_v25 = vld [vmem:[%s5015_s3 + $0x8] sm:$0xff] (!%p526_p12)  ;;  %v693_v26 = vld [vmem:[%s5015_s3 + $0x10] sm:$0xff] (!%p526_p12)  ;;  %619 = vst.msk [vmem:[#allocation2 + $0x50] sm:$0xff] (!%p526_p12), %vm608_vm0, %v3620_v30  ;;  %s3554_s22 = sshll.u32 (!%p526_p12), %s3627_s1, 4  ;;  %s3555_s22 = int_to_ptr.vmem [resolvable:$false] %s3554_s22 }
  0x43   : > { %v3331_v28 = vpack.c.bf16 (!%p526_p12), %v692_v25, %v691_v24  ;;  %v694_v29 = vld [vmem:[%s5015_s3 + $0x18] sm:$0xff] (!%p526_p12)  ;;  %620 = vst.msk [vmem:[#allocation2 + $0x58] sm:$0xff] (!%p526_p12), %vm608_vm0, %v3620_v30  ;;  %621 = vst.msk [vmem:[#allocation2 + $0x60] sm:$0xff] (!%p526_p12), %vm608_vm0, %v3620_v30  ;;  %v695_v32 = vld [vmem:[%s5015_s3 + $0x20] sm:$0xff] (!%p526_p12) }
  0x44   : > { %622 = vst.msk [vmem:[#allocation2 + $0x68] sm:$0xff] %vm608_vm0, %v3620_v30  ;;  %623 = vst.msk [vmem:[#allocation2 + $0x70] sm:$0xff] %vm608_vm0, %v3620_v30  ;;  %v3334_v31 = vpack.c.bf16 %v694_v29, %v693_v26  ;;  %v696_v33 = vld [vmem:[%s5015_s3 + $0x28] sm:$0xff]  ;;  %s5031_s16 = smov (!%p598_p13, %s597_s16), 5  ;;  %v697_v34 = vld [vmem:[%s5015_s3 + $0x30] sm:$0xff] }
  0x45   : > { %624 = vst.msk [vmem:[#allocation2 + $0x78] sm:$0xff] %vm608_vm0, %v3620_v30  ;;  %625 = vst.msk [vmem:[#allocation2 + $0x80] sm:$0xff] %vm608_vm0, %v3620_v30  ;;  %3332 = vmatpush3.bf16.msra.mxu0 %v3331_v28  ;;  %3410 = vmatpush3.bf16.msra.mxu1 %v3331_v28  ;;  %v698_v35 = vld [vmem:[%s5015_s3 + $0x38] sm:$0xff]  ;;  %v3337_v36 = vpack.c.bf16 %v696_v33, %v695_v32  ;;  %s2824_s25 = sshll.u32 %s5031_s16, 3  ;;  %v668_v39 = vld [vmem:[%s3878_s12 + $0x8] sm:$0xff] }
  0x46   : > { %626 = vst.msk [vmem:[#allocation2 + $0x88] sm:$0xff] %vm608_vm0, %v3620_v30  ;;  %627 = vst.msk [vmem:[#allocation2 + $0x90] sm:$0xff] %vm608_vm0, %v3620_v30  ;;  %3333 = vmatprep.subr.bf16.mxu0 %v3618_v27  ;;  %3403 = vmatprep.subr.bf16.mxu1 %v3618_v27  ;;  %s3887_s16 = scalar_lea.vmem %s5016_s0, %s2824_s25  ;;  %v643_v40 = vld [vmem:[%s3874_s30] sm:$0xff]  ;;  %v669_v41 = vld [vmem:[%s3878_s12 + $0x10] sm:$0xff]  ;;  %v3340_v51 = vpack.c.bf16 %v698_v35, %v697_v34  ;;  %s4769_s0 = scalar_lea.vmem [#allocation5], %s3421_s14 }
  0x47   : > { %628 = vst.msk [vmem:[#allocation2 + $0x98] sm:$0xff] %vm608_vm0, %v3620_v30  ;;  %629 = vst.msk [vmem:[#allocation2 + $0xa0] sm:$0xff] %vm608_vm0, %v3620_v30  ;;  %v644_v42 = vld [vmem:[%s3874_s30 + $0x8] sm:$0xff]  ;;  %v636_v43 = vld [vmem:[%s3887_s16] sm:$0xff]  ;;  %s3556_s14 = scalar_lea.vmem %s3555_s22, 768 }
  0x48   : > { %630 = vst.msk [vmem:[#allocation2 + $0xa8] sm:$0xff] %vm608_vm0, %v3620_v30  ;;  %631 = vst.msk [vmem:[#allocation2 + $0xb0] sm:$0xff] %vm608_vm0, %v3620_v30  ;;  %v637_v44 = vld [vmem:[%s3887_s16 + $0x8] sm:$0xff]  ;;  %v638_v45 = vld [vmem:[%s3887_s16 + $0x10] sm:$0xff] }
  0x49   : > { %632 = vst.msk [vmem:[#allocation2 + $0xb8] sm:$0xff] %vm608_vm0, %v3620_v30  ;;  %633 = vst.msk [vmem:[#allocation2 + $0xc0] sm:$0xff] %vm608_vm0, %v3620_v30  ;;  %3335 = vmatpush3.bf16.msra.mxu0 %v3334_v31  ;;  %3411 = vmatpush3.bf16.msra.mxu1 %v3334_v31  ;;  %v699_v46 = vld [vmem:[%s5015_s3 + $0x40] sm:$0xff]  ;;  %v700_v47 = vld [vmem:[%s5015_s3 + $0x48] sm:$0xff] }
  0x4a   : > { %634 = vst.msk [vmem:[#allocation2 + $0xc8] sm:$0xff] %vm608_vm0, %v3620_v30  ;;  %635 = vst.msk [vmem:[#allocation2 + $0xd0] sm:$0xff] %vm608_vm0, %v3620_v30  ;;  %3336 = vmatprep.subr.bf16.mxu0 %v3618_v27  ;;  %3404 = vmatprep.subr.bf16.mxu1 %v3618_v27  ;;  %v670_v48 = vld [vmem:[%s3878_s12 + $0x18] sm:$0xff]  ;;  %v645_v49 = vld [vmem:[%s3874_s30 + $0x10] sm:$0xff]  ;;  %v3343_v0 = vpack.c.bf16 %v700_v47, %v699_v46 }
  0x4b   : > { %666 = vst.msk [vmem:[#allocation2 + $0x70] sm:$0xff] %vm639_vm2, %v654_v37  ;;  %679 = vst.msk [vmem:[#allocation2 + $0x78] sm:$0xff] %vm639_vm2, %v667_v38  ;;  %v671_v50 = vld [vmem:[%s3878_s12 + $0x20] sm:$0xff]  ;;  %v646_v52 = vld [vmem:[%s3874_s30 + $0x18] sm:$0xff] }
  0x4c   : > { %680 = vst.msk [vmem:[#allocation2 + $0x80] sm:$0xff] %vm639_vm2, %v668_v39  ;;  %655 = vst.msk [vmem:[#allocation2 + $0x18] sm:$0xff] %vm639_vm2, %v643_v40  ;;  %v672_v53 = vld [vmem:[%s3878_s12 + $0x28] sm:$0xff]  ;;  %v647_v54 = vld [vmem:[%s3874_s30 + $0x20] sm:$0xff] }
  0x4d   : > { %681 = vst.msk [vmem:[#allocation2 + $0x88] sm:$0xff] %vm639_vm2, %v669_v41  ;;  %656 = vst.msk [vmem:[#allocation2 + $0x20] sm:$0xff] %vm639_vm2, %v644_v42  ;;  %3338 = vmatpush3.bf16.msra.mxu0 %v3337_v36  ;;  %3412 = vmatpush3.bf16.msra.mxu1 %v3337_v36  ;;  %v673_v55 = vld [vmem:[%s3878_s12 + $0x30] sm:$0xff]  ;;  %v648_v56 = vld [vmem:[%s3874_s30 + $0x28] sm:$0xff] }
  0x4e   : > { %640 = vst.msk [vmem:[#allocation2] sm:$0xff] %vm639_vm2, %v636_v43  ;;  %641 = vst.msk [vmem:[#allocation2 + $0x8] sm:$0xff] %vm639_vm2, %v637_v44  ;;  %3339 = vmatprep.subr.bf16.mxu0 %v3618_v27  ;;  %3405 = vmatprep.subr.bf16.mxu1 %v3618_v27  ;;  %v674_v57 = vld [vmem:[%s3878_s12 + $0x38] sm:$0xff]  ;;  %v649_v58 = vld [vmem:[%s3874_s30 + $0x30] sm:$0xff] }
  0x4f   : > { %642 = vst.msk [vmem:[#allocation2 + $0x10] sm:$0xff] %vm639_vm2, %v638_v45  ;;  %682 = vst.msk [vmem:[#allocation2 + $0x90] sm:$0xff] %vm639_vm2, %v670_v48  ;;  %v675_v59 = vld [vmem:[%s3878_s12 + $0x40] sm:$0xff]  ;;  %v650_v60 = vld [vmem:[%s3874_s30 + $0x38] sm:$0xff] }
  0x50   : > { %657 = vst.msk [vmem:[#allocation2 + $0x28] sm:$0xff] %vm639_vm2, %v645_v49  ;;  %683 = vst.msk [vmem:[#allocation2 + $0x98] sm:$0xff] %vm639_vm2, %v671_v50  ;;  %v676_v61 = vld [vmem:[%s3878_s12 + $0x48] sm:$0xff]  ;;  %v651_v62 = vld [vmem:[%s3874_s30 + $0x40] sm:$0xff] }
  0x51   : > { %658 = vst.msk [vmem:[#allocation2 + $0x30] sm:$0xff] %vm639_vm2, %v646_v52  ;;  %684 = vst.msk [vmem:[#allocation2 + $0xa0] sm:$0xff] %vm639_vm2, %v672_v53  ;;  %v677_v63 = vld [vmem:[%s3878_s12 + $0x50] sm:$0xff]  ;;  %3341 = vmatpush3.bf16.msra.mxu0 %v3340_v51  ;;  %3413 = vmatpush3.bf16.msra.mxu1 %v3340_v51  ;;  %v701_v1 = vld [vmem:[%s5015_s3 + $0x50] sm:$0xff] }
  0x52   : > { %659 = vst.msk [vmem:[#allocation2 + $0x38] sm:$0xff] %vm639_vm2, %v647_v54  ;;  %685 = vst.msk [vmem:[#allocation2 + $0xa8] sm:$0xff] %vm639_vm2, %v673_v55  ;;  %3342 = vmatprep.subr.bf16.mxu0 %v3618_v27  ;;  %3406 = vmatprep.subr.bf16.mxu1 %v3618_v27  ;;  %v702_v2 = vld [vmem:[%s5015_s3 + $0x58] sm:$0xff]  ;;  %v703_v4 = vld [vmem:[%s5015_s3 + $0x60] sm:$0xff] }
  0x53   : > { %660 = vst.msk [vmem:[#allocation2 + $0x40] sm:$0xff] %vm639_vm2, %v648_v56  ;;  %686 = vst.msk [vmem:[#allocation2 + $0xb0] sm:$0xff] %vm639_vm2, %v674_v57  ;;  %v3346_v3 = vpack.c.bf16 %v702_v2, %v701_v1  ;;  %v704_v5 = vld [vmem:[%s5015_s3 + $0x68] sm:$0xff]  ;;  %v652_v7 = vld [vmem:[%s3874_s30 + $0x48] sm:$0xff] }
  0x54   : > { %661 = vst.msk [vmem:[#allocation2 + $0x48] sm:$0xff] %vm639_vm2, %v649_v58  ;;  %687 = vst.msk [vmem:[#allocation2 + $0xb8] sm:$0xff] %vm639_vm2, %v675_v59  ;;  %v3349_v6 = vpack.c.bf16 %v704_v5, %v703_v4  ;;  %v678_v8 = vld [vmem:[%s3878_s12 + $0x58] sm:$0xff]  ;;  %v653_v9 = vld [vmem:[%s3874_s30 + $0x50] sm:$0xff] }
  0x55   : > { %662 = vst.msk [vmem:[#allocation2 + $0x50] sm:$0xff] %vm639_vm2, %v650_v60  ;;  %688 = vst.msk [vmem:[#allocation2 + $0xc0] sm:$0xff] %vm639_vm2, %v676_v61  ;;  %3344 = vmatpush3.bf16.msra.mxu0 %v3343_v0  ;;  %3414 = vmatpush3.bf16.msra.mxu1 %v3343_v0  ;;  %v705_v10 = vld [vmem:[%s5015_s3 + $0x70] sm:$0xff]  ;;  %v706_v11 = vld [vmem:[%s5015_s3 + $0x78] sm:$0xff]  ;;  %s4817_s3 = scalar_lea.vmem [#allocation9], %s3855_s24  ;;  %s4872_s24 = smul.u32 384, %s3725_s21 }
  0x56   : > { %663 = vst.msk [vmem:[#allocation2 + $0x58] sm:$0xff] %vm639_vm2, %v651_v62  ;;  %689 = vst.msk [vmem:[#allocation2 + $0xc8] sm:$0xff] %vm639_vm2, %v677_v63  ;;  %3345 = vmatprep.subr.bf16.mxu0 %v3618_v27  ;;  %3407 = vmatprep.subr.bf16.mxu1 %v3618_v27  ;;  %v3352_v12 = vpack.c.bf16 %v706_v11, %v705_v10  ;;  %v708_v15 = vld [vmem:[#allocation2] sm:$0xff]  ;;  %v722_v16 = vld [vmem:[#allocation2 + $0x70] sm:$0xff] }
  0x57   : > { %664 = vst.msk [vmem:[#allocation2 + $0x60] sm:$0xff] %vm639_vm2, %v652_v7  ;;  %690 = vst.msk [vmem:[#allocation2 + $0xd0] sm:$0xff] %vm639_vm2, %v678_v8  ;;  %v709_v20 = vld [vmem:[#allocation2 + $0x8] sm:$0xff]  ;;  %v723_v21 = vld [vmem:[#allocation2 + $0x78] sm:$0xff]  ;;  %s4887_s15 = scalar_lea.hbm %s5001_s9, %s4872_s24 }
  0x58   : > { %665 = vst.msk [vmem:[#allocation2 + $0x68] sm:$0xff] %vm639_vm2, %v653_v9  ;;  %v1051_v24 = vld [vmem:[%s4997_s5 + $0x28] sm:$0xff]  ;;  %v710_v25 = vld [vmem:[#allocation2 + $0x10] sm:$0xff]  ;;  %v724_v26 = vld [vmem:[#allocation2 + $0x80] sm:$0xff] }
  0x59   : > { %3347 = vmatpush3.bf16.msra.mxu0 %v3346_v3  ;;  %3415 = vmatpush3.bf16.msra.mxu1 %v3346_v3  ;;  %v3361_v28 = vpack.c.bf16 %v1051_v24, %v1050_v23  ;;  %v1052_v29 = vld [vmem:[%s4997_s5 + $0x30] sm:$0xff]  ;;  %v1053_v31 = vld [vmem:[%s4997_s5 + $0x38] sm:$0xff]  ;;  %v711_v32 = vld [vmem:[#allocation2 + $0x18] sm:$0xff] }
  0x5a   : > { %3348 = vmatprep.subr.bf16.mxu0 %v3618_v27  ;;  %3408 = vmatprep.subr.bf16.mxu1 %v3618_v27  ;;  %v725_v33 = vld [vmem:[#allocation2 + $0x88] sm:$0xff]  ;;  %v3364_v34 = vpack.c.bf16 %v1053_v31, %v1052_v29  ;;  %v1054_v35 = vld [vmem:[%s4997_s5 + $0x40] sm:$0xff]  ;;  %v1055_v36 = vld [vmem:[%s4997_s5 + $0x48] sm:$0xff] }
  0x5b   : > { %v712_v37 = vld [vmem:[#allocation2 + $0x20] sm:$0xff]  ;;  %v726_v38 = vld [vmem:[#allocation2 + $0x90] sm:$0xff]  ;;  %v3367_v39 = vpack.c.bf16 %v1055_v36, %v1054_v35  ;;  %v713_v40 = vld [vmem:[#allocation2 + $0x28] sm:$0xff] }
  0x5c   : > { %v727_v41 = vld [vmem:[#allocation2 + $0x98] sm:$0xff]  ;;  %v714_v42 = vld [vmem:[#allocation2 + $0x30] sm:$0xff]  ;;  %v728_v43 = vld [vmem:[#allocation2 + $0xa0] sm:$0xff] }
  0x5d   : > { %3350 = vmatpush3.bf16.msra.mxu0 %v3349_v6  ;;  %3416 = vmatpush3.bf16.msra.mxu1 %v3349_v6  ;;  %v715_v44 = vld [vmem:[#allocation2 + $0x38] sm:$0xff]  ;;  %v729_v45 = vld [vmem:[#allocation2 + $0xa8] sm:$0xff]  ;;  %v716_v46 = vld [vmem:[#allocation2 + $0x40] sm:$0xff] }
  0x5e   : > { %3351 = vmatprep.subr.bf16.mxu0 %v3618_v27  ;;  %3409 = vmatprep.subr.bf16.mxu1 %v3618_v27  ;;  %v730_v47 = vld [vmem:[#allocation2 + $0xb0] sm:$0xff]  ;;  %v717_v48 = vld [vmem:[#allocation2 + $0x48] sm:$0xff]  ;;  %v731_v49 = vld [vmem:[#allocation2 + $0xb8] sm:$0xff] }
  0x5f   : > { %v718_v50 = vld [vmem:[#allocation2 + $0x50] sm:$0xff]  ;;  %v732_v51 = vld [vmem:[#allocation2 + $0xc0] sm:$0xff]  ;;  %v719_v52 = vld [vmem:[#allocation2 + $0x58] sm:$0xff] }
  0x60   : > { %v733_v53 = vld [vmem:[#allocation2 + $0xc8] sm:$0xff]  ;;  %v720_v54 = vld [vmem:[#allocation2 + $0x60] sm:$0xff]  ;;  %v734_v55 = vld [vmem:[#allocation2 + $0xd0] sm:$0xff] }
  0x61   : > { %3353 = vmatpush3.bf16.msra.mxu0 %v3352_v12  ;;  %3417 = vmatpush3.bf16.msra.mxu1 %v3352_v12  ;;  %v721_v56 = vld [vmem:[#allocation2 + $0x68] sm:$0xff]  ;;  %v1056_v57 = vld [vmem:[%s4997_s5 + $0x50] sm:$0xff]  ;;  %v1058_v60 = vld [vmem:[%s4997_s5 + $0x60] sm:$0xff] }
  0x62   : > { %3354 = vmatprep.subr.bf16.mxu1 %v3618_v27  ;;  %3378 = vmatprep.subr.bf16.mxu0 %v3618_v27  ;;  %v1057_v58 = vld [vmem:[%s4997_s5 + $0x58] sm:$0xff]  ;;  %v1059_v61 = vld [vmem:[%s4997_s5 + $0x68] sm:$0xff]  ;;  %v1060_v63 = vld [vmem:[%s4997_s5 + $0x70] sm:$0xff] }
  0x63   : > { %v3370_v59 = vpack.c.bf16 %v1057_v58, %v1056_v57  ;;  %v3373_v62 = vpack.c.bf16 %v1059_v61, %v1058_v60  ;;  %v1061_v0 = vld [vmem:[%s4997_s5 + $0x78] sm:$0xff]  ;;  %v1419_v2 = vld [vmem:[%s4999_s7] sm:$0xff]  ;;  %v1420_v3 = vld [vmem:[%s4999_s7 + $0x8] sm:$0xff] }
  0x64   : > { %3024 = vmatmul.mubr.f32.vlgmr.msra.gmra.mrb[0].mxu0 %v708_v15  ;;  %3066 = vmatmul.mubr.f32.vlgmr.msra.gmra.mrb[0].mxu1 %v722_v16  ;;  %v3376_v1 = vpack.c.bf16 %v1061_v0, %v1060_v63  ;;  %v1421_v4 = vld [vmem:[%s4999_s7 + $0x10] sm:$0xff]  ;;  %v3379_v5 = vpack.c.bf16 %v1420_v3, %v1419_v2  ;;  %v1422_v6 = vld [vmem:[%s4999_s7 + $0x18] sm:$0xff]  ;;  %v1423_v8 = vld [vmem:[%s4999_s7 + $0x20] sm:$0xff] }
  0x65   : > { %3026 = vmatprep.mubr.msk.f32.mxu0 %vm3619_vm1, %v3620_v30  ;;  %3068 = vmatprep.mubr.msk.f32.mxu1 %vm3619_vm1, %v3620_v30  ;;  %v3382_v7 = vpack.c.bf16 %v1422_v6, %v1421_v4  ;;  %v1424_v9 = vld [vmem:[%s4999_s7 + $0x28] sm:$0xff]  ;;  %v2825_v11 = vld [vmem:[%s4996_s4] ss:$0 sm:$0xff] }
  0x66   : > { %3356 = vmatpush3.bf16.msra.mxu1 %v3355_v17  ;;  %3380 = vmatpush3.bf16.msra.mxu0 %v3379_v5  ;;  %v3385_v10 = vpack.c.bf16 %v1424_v9, %v1423_v8 }
  0x67   : > { %3357 = vmatprep.subr.bf16.mxu1 %v3618_v27  ;;  %3381 = vmatprep.subr.bf16.mxu0 %v3618_v27 }
  0x68   : > { %3027 = vmatmul.mubr.f32.gmra.mrb[2].mxu0 %v709_v20  ;;  %3069 = vmatmul.mubr.f32.gmra.mrb[2].mxu1 %v723_v21 }
  0x69   : > { %3029 = vmatprep.mubr.msk.f32.mxu0 %vm3619_vm1, %v3620_v30  ;;  %3071 = vmatprep.mubr.msk.f32.mxu1 %vm3619_vm1, %v3620_v30 }
  0x6a   : > { %3359 = vmatpush3.bf16.msra.mxu1 %v3358_v22  ;;  %3383 = vmatpush3.bf16.msra.mxu0 %v3382_v7 }
  0x6b   : > { %3360 = vmatprep.subr.bf16.mxu1 %v3618_v27  ;;  %3384 = vmatprep.subr.bf16.mxu0 %v3618_v27 }
  0x6c   : > { %3030 = vmatmul.mubr.f32.gmra.mrb[4].mxu0 %v710_v25  ;;  %3072 = vmatmul.mubr.f32.gmra.mrb[4].mxu1 %v724_v26 }
  0x6d   : > { %3032 = vmatprep.mubr.msk.f32.mxu0 %vm3619_vm1, %v3620_v30  ;;  %3074 = vmatprep.mubr.msk.f32.mxu1 %vm3619_vm1, %v3620_v30 }
  0x6e   : > { %3362 = vmatpush3.bf16.msra.mxu1 %v3361_v28  ;;  %3386 = vmatpush3.bf16.msra.mxu0 %v3385_v10 }
  0x6f   : > { %3363 = vmatprep.subr.bf16.mxu1 %v3618_v27  ;;  %3387 = vmatprep.subr.bf16.mxu0 %v3618_v27 }
  0x70   : > { %3033 = vmatmul.mubr.f32.gmra.mrb[6].mxu0 %v711_v32  ;;  %3075 = vmatmul.mubr.f32.gmra.mrb[6].mxu1 %v725_v33 }
  0x71   : > { %3035 = vmatprep.mubr.msk.f32.mxu0 %vm3619_vm1, %v3620_v30  ;;  %3077 = vmatprep.mubr.msk.f32.mxu1 %vm3619_vm1, %v3620_v30 }
  0x72   : > { %3365 = vmatpush3.bf16.msra.mxu1 %v3364_v34 }
  0x73   : > { %3366 = vmatprep.subr.bf16.mxu1 %v3618_v27 }
  0x74   : > { %3036 = vmatmul.mubr.f32.gmra.mrb[8].mxu0 %v712_v37  ;;  %3078 = vmatmul.mubr.f32.gmra.mrb[8].mxu1 %v726_v38 }
  0x75   : > { %3038 = vmatprep.mubr.msk.f32.mxu0 %vm3619_vm1, %v3620_v30  ;;  %3080 = vmatprep.mubr.msk.f32.mxu1 %vm3619_vm1, %v3620_v30 }
  0x76   : > { %3368 = vmatpush3.bf16.msra.mxu1 %v3367_v39 }
  0x77   : > { %3369 = vmatprep.subr.bf16.mxu1 %v3618_v27 }
  0x78   : > { %3039 = vmatmul.mubr.f32.gmra.mrb[10].mxu0 %v713_v40  ;;  %3081 = vmatmul.mubr.f32.gmra.mrb[10].mxu1 %v727_v41 }
  0x79   : > { %3041 = vmatprep.mubr.msk.f32.mxu0 %vm3619_vm1, %v3620_v30  ;;  %3083 = vmatprep.mubr.msk.f32.mxu1 %vm3619_vm1, %v3620_v30 }
  0x7a   : > { %3371 = vmatpush3.bf16.msra.mxu1 %v3370_v59 }
  0x7b   : > { %3372 = vmatprep.subr.bf16.mxu1 %v3618_v27 }
  0x7c   : > { %3042 = vmatmul.mubr.f32.gmra.mrb[12].mxu0 %v714_v42  ;;  %3084 = vmatmul.mubr.f32.gmra.mrb[12].mxu1 %v728_v43 }
  0x7d   : > { %3044 = vmatprep.mubr.msk.f32.mxu0 %vm3619_vm1, %v3620_v30  ;;  %3086 = vmatprep.mubr.msk.f32.mxu1 %vm3619_vm1, %v3620_v30 }
  0x7e   : > { %3374 = vmatpush3.bf16.msra.mxu1 %v3373_v62 }
  0x7f   : > { %3375 = vmatprep.subr.bf16.mxu1 %v3618_v27 }
  0x80   : > { %3045 = vmatmul.mubr.f32.gmra.mrb[14].mxu0 %v715_v44  ;;  %3087 = vmatmul.mubr.f32.gmra.mrb[14].mxu1 %v729_v45 }
  0x81   : > { %3047 = vmatprep.mubr.msk.f32.mxu0 %vm3619_vm1, %v3620_v30  ;;  %3089 = vmatprep.mubr.msk.f32.mxu1 %vm3619_vm1, %v3620_v30 }
  0x82   : > { %3377 = vmatpush3.bf16.msra.mxu1 %v3376_v1 }
  0x84   : > { %3048 = vmatmul.mubr.f32.gmra.mrb[16].mxu0 %v716_v46  ;;  %3090 = vmatmul.mubr.f32.gmra.mrb[16].mxu1 %v730_v47 }
  0x85   : > { %3050 = vmatprep.mubr.msk.f32.mxu0 %vm3619_vm1, %v3620_v30  ;;  %3092 = vmatprep.mubr.msk.f32.mxu1 %vm3619_vm1, %v3620_v30 }
  0x88   : > { %3051 = vmatmul.mubr.f32.gmra.mrb[18].mxu0 %v717_v48  ;;  %3093 = vmatmul.mubr.f32.gmra.mrb[18].mxu1 %v731_v49 }
  0x89   : > { %3053 = vmatprep.mubr.msk.f32.mxu0 %vm3619_vm1, %v3620_v30  ;;  %3095 = vmatprep.mubr.msk.f32.mxu1 %vm3619_vm1, %v3620_v30 }
  0x8c   : > { %3054 = vmatmul.mubr.f32.gmra.mrb[20].mxu0 %v718_v50  ;;  %3096 = vmatmul.mubr.f32.gmra.mrb[20].mxu1 %v732_v51 }
  0x8d   : > { %3056 = vmatprep.mubr.msk.f32.mxu0 %vm3619_vm1, %v3620_v30  ;;  %3098 = vmatprep.mubr.msk.f32.mxu1 %vm3619_vm1, %v3620_v30 }
  0x90   : > { %3057 = vmatmul.mubr.f32.gmra.mrb[22].mxu0 %v719_v52  ;;  %3099 = vmatmul.mubr.f32.gmra.mrb[22].mxu1 %v733_v53 }
  0x91   : > { %3059 = vmatprep.mubr.msk.f32.mxu0 %vm3619_vm1, %v3620_v30  ;;  %3101 = vmatprep.mubr.msk.f32.mxu1 %vm3619_vm1, %v3620_v30 }
  0x94   : > { %3060 = vmatmul.mubr.f32.gmra.mrb[24].mxu0 %v720_v54  ;;  %3102 = vmatmul.mubr.f32.gmra.mrb[24].mxu1 %v734_v55 }
  0x95   : > { %3062 = vmatprep.mubr.msk.f32.mxu0 %vm3619_vm1, %v3620_v30  ;;  %3136 = vmatprep.mubr.msk.f32.mxu1 %vm3619_vm1, %v3620_v30 }
  0x98   : > { %3063 = vmatmul.mubr.f32.gmra.mrb[26].mxu0 %v721_v56 }
  0x99   : > { %3249 = vmatprep.mubr.msk.f32.mxu0 %vm3619_vm1, %v3620_v30 }
 0x137   : > { %v801_v12 = vpop.f32.mrb[0].mxu0  ;;  %v4108_v13 = vpop.f32.mrb[0].mxu1 }
 0x138   : > { %v941_v14 = vadd.f32 %v2825_v11, %v801_v12  ;;  %v3025_v15 = vpop.f32.mrb[1].mxu0  ;;  %v3067_v16 = vpop.f32.mrb[1].mxu1  ;;  %v982_v1 = vmul.f32 %v4108_v13, %v4108_v13 }
 0x13a   : > { %3520 = vtanh.f32 %v941_v14 }
 0x13b   : > { %v806_v17 = vpop.f32.mrb[2].mxu0  ;;  %v876_v18 = vpop.f32.mrb[2].mxu1 }
 0x13c   : > { %v942_v19 = vadd.f32 %v2825_v11, %v806_v17  ;;  %v3028_v20 = vpop.f32.mrb[3].mxu0  ;;  %v3070_v21 = vpop.f32.mrb[3].mxu1 }
 0x13e   : > { %3522 = vtanh.f32 %v942_v19 }
 0x13f   : > { %v811_v22 = vpop.f32.mrb[4].mxu0  ;;  %v881_v23 = vpop.f32.mrb[4].mxu1 }
 0x140   : > { %v943_v24 = vadd.f32 %v2825_v11, %v811_v22  ;;  %v3031_v25 = vpop.f32.mrb[5].mxu0  ;;  %v3073_v26 = vpop.f32.mrb[5].mxu1 }
 0x142   : > { %3524 = vtanh.f32 %v943_v24 }
 0x143   : > { %v886_v28 = vpop.f32.mrb[6].mxu1  ;;  %v816_v29 = vpop.f32.mrb[6].mxu0 }
 0x144   : > { %v3521_v31 = vpop.eup %3520  ;;  %v3076_v32 = vpop.f32.mrb[7].mxu1  ;;  %v971_v37 = vmul.f32 %v816_v29, %v816_v29 }
 0x145   : > { %v3034_v33 = vpop.f32.mrb[7].mxu0  ;;  %v947_v34 = vmul.f32 %v3521_v31, %v3521_v31  ;;  %3137 = vmatmul.mubr.f32.vlgmr.msra.gmra.mrb[26].mxu1 %v3521_v31  ;;  %v953_v36 = vmul.f32 -2.0, %v3521_v31 }
 0x146   : > { %3139 = vmatprep.mubr.msk.f32.mxu1 %vm3619_vm1, %v3620_v30 }
 0x147   : > { %v4113_v35 = vsub.f32 1.0, %v947_v34  ;;  %v891_v38 = vpop.f32.mrb[8].mxu1  ;;  %v821_v39 = vpop.f32.mrb[8].mxu0 }
 0x148   : > { %v3523_v40 = vpop.eup %3522  ;;  %v3079_v41 = vpop.f32.mrb[9].mxu1  ;;  %v972_v54 = vmul.f32 %v821_v39, %v821_v39 }
 0x149   : > { %v3037_v42 = vpop.f32.mrb[9].mxu0  ;;  %v948_v43 = vmul.f32 %v3523_v40, %v3523_v40  ;;  %v995_v44 = vmul.f32 %v4113_v35, %v876_v18  ;;  %v4117_v45 = vmul.f32 %v953_v36, %v4113_v35  ;;  %v959_v46 = vmul.f32 %v4113_v35, %v816_v29  ;;  %3140 = vmatmul.mubr.f32.gmra.mrb[28].mxu1 %v3523_v40 }
 0x14a   : > { %v998_v47 = vmul.f32 %v4113_v35, %v891_v38  ;;  %3142 = vmatprep.mubr.msk.f32.mxu1 %vm3619_vm1, %v3620_v30  ;;  %v954_v53 = vmul.f32 -2.0, %v3523_v40 }
 0x14b   : > { %v4123_v48 = vsub.f32 1.0, %v948_v43  ;;  %v983_v49 = vmul.f32 %v971_v37, %v4117_v45  ;;  %v896_v50 = vpop.f32.mrb[10].mxu1  ;;  %v826_v51 = vpop.f32.mrb[10].mxu0 }
 0x14c   : > { %v3525_v52 = vpop.eup %3524  ;;  %v3040_v55 = vpop.f32.mrb[11].mxu0  ;;  %v973_v2 = vmul.f32 %v826_v51, %v826_v51 }
 0x14d   : > { %v3082_v56 = vpop.f32.mrb[11].mxu1  ;;  %v949_v57 = vmul.f32 %v3525_v52, %v3525_v52  ;;  %v996_v58 = vmul.f32 %v4123_v48, %v881_v23  ;;  %v4127_v59 = vadd.f32 %v995_v44, %v983_v49  ;;  %3143 = vmatmul.mubr.f32.gmra.mrb[30].mxu1 %v3525_v52  ;;  %v4130_v60 = vmul.f32 %v954_v53, %v4123_v48 }
 0x14e   : > { %v960_v61 = vmul.f32 %v4123_v48, %v821_v39  ;;  %v999_v62 = vmul.f32 %v4123_v48, %v896_v50  ;;  %3145 = vmatprep.mubr.msk.f32.mxu1 %vm3619_vm1, %v3620_v30  ;;  %v955_v0 = vmul.f32 -2.0, %v3525_v52 }
 0x14f   : > { %v4136_v63 = vsub.f32 1.0, %v949_v57  ;;  %v831_v3 = vpop.f32.mrb[12].mxu0  ;;  %v901_v4 = vpop.f32.mrb[12].mxu1  ;;  %v984_v5 = vmul.f32 %v972_v54, %v4130_v60 }
 0x150   : > { %v962_v6 = vmul.f32 %v4113_v35, %v831_v3  ;;  %v974_v7 = vmul.f32 %v831_v3, %v831_v3  ;;  %v3043_v8 = vpop.f32.mrb[13].mxu0  ;;  %v3085_v9 = vpop.f32.mrb[13].mxu1 }
 0x151   : > { %v4143_v10 = vmul.f32 %v955_v0, %v4136_v63  ;;  %v4147_v11 = vmul.f32 %v4136_v63, %v4108_v13  ;;  %v997_v12 = vmul.f32 %v4136_v63, %v886_v28  ;;  %v961_v14 = vmul.f32 %v4136_v63, %v826_v51  ;;  %3146 = vmatmul.mubr.f32.gmra.mrb[32].mxu1 %v959_v46 }
 0x152   : > { %v4151_v15 = vadd.f32 %v996_v58, %v984_v5  ;;  %v986_v16 = vmul.f32 %v974_v7, %v4117_v45  ;;  %v1000_v17 = vmul.f32 %v4136_v63, %v901_v4  ;;  %3148 = vmatprep.mubr.msk.f32.mxu1 %vm3619_vm1, %v3620_v30 }
 0x153   : > { %v4158_v18 = vmul.f32 %v982_v1, %v4143_v10  ;;  %v985_v13 = vmul.f32 %v973_v2, %v4143_v10  ;;  %v836_v19 = vpop.f32.mrb[14].mxu0  ;;  %v906_v20 = vpop.f32.mrb[14].mxu1 }
 0x154   : > { %v4161_v21 = vadd.f32 %v998_v47, %v986_v16  ;;  %v963_v22 = vmul.f32 %v4123_v48, %v836_v19  ;;  %v975_v23 = vmul.f32 %v836_v19, %v836_v19  ;;  %v1001_v24 = vmul.f32 %v4113_v35, %v906_v20  ;;  %v3046_v25 = vpop.f32.mrb[15].mxu0  ;;  %v3088_v26 = vpop.f32.mrb[15].mxu1 }
 0x155   : > { %v4165_v28 = vadd.f32 %v997_v12, %v985_v13  ;;  %3149 = vmatmul.mubr.f32.gmra.mrb[34].mxu1 %v960_v61 }
 0x156   : > { %v987_v29 = vmul.f32 %v975_v23, %v4130_v60  ;;  %3151 = vmatprep.mubr.msk.f32.mxu1 %vm3619_vm1, %v3620_v30 }
 0x157   : > { %v841_v31 = vpop.f32.mrb[16].mxu0  ;;  %v911_v32 = vpop.f32.mrb[16].mxu1 }
 0x158   : > { %v4170_v33 = vadd.f32 %v999_v62, %v987_v29  ;;  %v964_v34 = vmul.f32 %v4136_v63, %v841_v31  ;;  %v976_v36 = vmul.f32 %v841_v31, %v841_v31  ;;  %v1002_v37 = vmul.f32 %v4123_v48, %v911_v32  ;;  %v3049_v38 = vpop.f32.mrb[17].mxu0  ;;  %v3091_v39 = vpop.f32.mrb[17].mxu1  ;;  %v1431_v31 = vld [vmem:[%s4999_s7 + $0x60] sm:$0xff]  ;;  %v1432_v32 = vld [vmem:[%s4999_s7 + $0x68] sm:$0xff] }
 0x159   : > { %3152 = vmatmul.mubr.f32.gmra.mrb[36].mxu1 %v961_v14  ;;  %v2826_v38 = vld [vmem:[%s4998_s6] ss:$0 sm:$0xff] }
 0x15a   : > { %v988_v40 = vmul.f32 %v976_v36, %v4143_v10  ;;  %3154 = vmatprep.mubr.msk.f32.mxu1 %vm3619_vm1, %v3620_v30  ;;  %v1434_v36 = vld [vmem:[%s4999_s7 + $0x78] sm:$0xff] }
 0x15b   : > { %v846_v41 = vpop.f32.mrb[18].mxu0  ;;  %v916_v42 = vpop.f32.mrb[18].mxu1 }
 0x15c   : > { %v4177_v43 = vadd.f32 %v1000_v17, %v988_v40  ;;  %v965_v44 = vmul.f32 %v4113_v35, %v846_v41  ;;  %v977_v46 = vmul.f32 %v846_v41, %v846_v41  ;;  %v1003_v47 = vmul.f32 %v4136_v63, %v916_v42  ;;  %v3052_v49 = vpop.f32.mrb[19].mxu0  ;;  %v3094_v50 = vpop.f32.mrb[19].mxu1 }
 0x15d   : > { %3155 = vmatmul.mubr.f32.gmra.mrb[38].mxu1 %v962_v6 }
 0x15e   : > { %v989_v51 = vmul.f32 %v977_v46, %v4117_v45  ;;  %3157 = vmatprep.mubr.msk.f32.mxu1 %vm3619_vm1, %v3620_v30 }
 0x15f   : > { %v851_v52 = vpop.f32.mrb[20].mxu0  ;;  %v921_v53 = vpop.f32.mrb[20].mxu1 }
 0x160   : > { %v1013_v54 = vadd.f32 %v1001_v24, %v989_v51  ;;  %v966_v55 = vmul.f32 %v4123_v48, %v851_v52  ;;  %v978_v56 = vmul.f32 %v851_v52, %v851_v52  ;;  %v1004_v57 = vmul.f32 %v4113_v35, %v921_v53  ;;  %v3055_v58 = vpop.f32.mrb[21].mxu0  ;;  %v3097_v61 = vpop.f32.mrb[21].mxu1 }
 0x161   : > { %3158 = vmatmul.mubr.f32.gmra.mrb[40].mxu1 %v963_v22 }
 0x162   : > { %v990_v62 = vmul.f32 %v978_v56, %v4130_v60  ;;  %3160 = vmatprep.mubr.msk.f32.mxu1 %vm3619_vm1, %v3620_v30 }
 0x163   : > { %v856_v0 = vpop.f32.mrb[22].mxu0  ;;  %v926_v1 = vpop.f32.mrb[22].mxu1 }
 0x164   : > { %v1014_v2 = vadd.f32 %v1002_v37, %v990_v62  ;;  %v967_v3 = vmul.f32 %v4136_v63, %v856_v0  ;;  %v979_v4 = vmul.f32 %v856_v0, %v856_v0  ;;  %v1005_v5 = vmul.f32 %v4123_v48, %v926_v1  ;;  %v3058_v6 = vpop.f32.mrb[23].mxu0  ;;  %v3100_v7 = vpop.f32.mrb[23].mxu1 }
 0x165   : > { %3161 = vmatmul.mubr.f32.gmra.mrb[42].mxu1 %v964_v34  ;;  %v1433_v34 = vld [vmem:[%s4999_s7 + $0x70] sm:$0xff] }
 0x166   : > { %v991_v8 = vmul.f32 %v979_v4, %v4143_v10  ;;  %3163 = vmatprep.mubr.msk.f32.mxu1 %vm3619_vm1, %v3620_v30  ;;  %v3400_v37 = vpack.c.bf16 %v1434_v36, %v1433_v34 }
 0x167   : > { %v861_v9 = vpop.f32.mrb[24].mxu0  ;;  %v931_v12 = vpop.f32.mrb[24].mxu1 }
 0x168   : > { %v1015_v14 = vadd.f32 %v1003_v47, %v991_v8  ;;  %v968_v16 = vmul.f32 %v4113_v35, %v861_v9  ;;  %v980_v17 = vmul.f32 %v861_v9, %v861_v9  ;;  %v1006_v13 = vmul.f32 %v4136_v63, %v931_v12  ;;  %v3061_v19 = vpop.f32.mrb[25].mxu0  ;;  %v3103_v20 = vpop.f32.mrb[25].mxu1 }
 0x169   : > { %3164 = vmatmul.mubr.f32.gmra.mrb[44].mxu1 %v965_v44 }
 0x16a   : > { %v992_v22 = vmul.f32 %v980_v17, %v4117_v45  ;;  %v1018_v23 = vadd.f32 %v1006_v13, %v4158_v18  ;;  %3166 = vmatprep.mubr.msk.f32.mxu1 %vm3619_vm1, %v3620_v30  ;;  %v1425_v45 = vld [vmem:[%s4999_s7 + $0x30] sm:$0xff] }
 0x16b   : > { %v866_v10 = vpop.f32.mrb[26].mxu0  ;;  %v1429_v18 = vld [vmem:[%s4999_s7 + $0x50] sm:$0xff] }
 0x16c   : > { %v1016_v24 = vadd.f32 %v1004_v57, %v992_v22  ;;  %v969_v25 = vmul.f32 %v4123_v48, %v866_v10  ;;  %v981_v26 = vmul.f32 %v866_v10, %v866_v10  ;;  %v3064_v29 = vpop.f32.mrb[27].mxu0  ;;  %v1426_v48 = vld [vmem:[%s4999_s7 + $0x38] sm:$0xff] }
 0x16d   : > { %3167 = vmatmul.mubr.f32.gmra.mrb[46].mxu1 %v966_v55 }
 0x16e   : > { %v993_v35 = vmul.f32 %v981_v26, %v4130_v60  ;;  %3169 = vmatprep.mubr.msk.f32.mxu1 %vm3619_vm1, %v3620_v30  ;;  %v1427_v60 = vld [vmem:[%s4999_s7 + $0x40] sm:$0xff] }
 0x170   : > { %v1017_v63 = vadd.f32 %v1005_v5, %v993_v35 }
 0x171   : > { %3170 = vmatmul.mubr.f32.gmra.mrb[48].mxu1 %v967_v3 }
 0x172   : > { %3172 = vmatprep.mubr.msk.f32.mxu1 %vm3619_vm1, %v3620_v30 }
 0x175   : > { %3173 = vmatmul.mubr.f32.gmra.mrb[50].mxu1 %v968_v16 }
 0x176   : > { %3175 = vmatprep.mubr.msk.f32.mxu1 %vm3619_vm1, %v3620_v30 }
 0x179   : > { %3176 = vmatmul.mubr.f32.gmra.mrb[52].mxu1 %v969_v25 }
 0x17a   : > { %3178 = vmatprep.mubr.msk.f32.mxu1 %vm3619_vm1, %v3620_v30 }
 0x17d   : > { %3179 = vmatmul.mubr.f32.gmra.mrb[54].mxu1 %v4147_v11  ;;  %v1428_v11 = vld [vmem:[%s4999_s7 + $0x48] sm:$0xff] }
 0x17e   : > { %3181 = vmatprep.mubr.msk.f32.mxu1 %vm3619_vm1, %v3620_v30 }
 0x181   : > { %3182 = vmatmul.mubr.f32.gmra.mrb[56].mxu1 %v4127_v59  ;;  %v3388_v59 = vpack.c.bf16 %v1426_v48, %v1425_v45 }
 0x182   : > { %3184 = vmatprep.mubr.msk.f32.mxu1 %vm3619_vm1, %v3620_v30 }
 0x183   : > { %3389 = vmatpush3.bf16.msra.mxu0 %v3388_v59 }
 0x184   : > { %3390 = vmatprep.subr.bf16.mxu0 %v3618_v27 }
 0x185   : > { %3185 = vmatmul.mubr.f32.gmra.mrb[58].mxu1 %v4151_v15  ;;  %v3391_v15 = vpack.c.bf16 %v1428_v11, %v1427_v60 }
 0x186   : > { %3187 = vmatprep.mubr.msk.f32.mxu1 %vm3619_vm1, %v3620_v30 }
 0x187   : > { %3392 = vmatpush3.bf16.msra.mxu0 %v3391_v15 }
 0x188   : > { %3393 = vmatprep.subr.bf16.mxu0 %v3618_v27 }
 0x189   : > { %3188 = vmatmul.mubr.f32.gmra.mrb[60].mxu1 %v4165_v28 }
 0x18a   : > { %3190 = vmatprep.mubr.msk.f32.mxu1 %vm3619_vm1, %v3620_v30 }
 0x18d   : > { %3191 = vmatmul.mubr.f32.gmra.mrb[62].mxu1 %v4161_v21  ;;  %v1430_v21 = vld [vmem:[%s4999_s7 + $0x58] sm:$0xff] }
 0x18e   : > { %3193 = vmatprep.mubr.msk.f32.mxu1 %vm3619_vm1, %v3620_v30  ;;  %v3394_v28 = vpack.c.bf16 %v1430_v21, %v1429_v18 }
 0x190   : > { %3395 = vmatpush3.bf16.msra.mxu0 %v3394_v28 }
 0x191   : > { %3194 = vmatmul.mubr.f32.gmra.mrb[64].mxu1 %v4170_v33  ;;  %3396 = vmatprep.subr.bf16.mxu0 %v3618_v27  ;;  %v3397_v33 = vpack.c.bf16 %v1432_v32, %v1431_v31 }
 0x192   : > { %3196 = vmatprep.mubr.msk.f32.mxu1 %vm3619_vm1, %v3620_v30 }
 0x194   : > { %3398 = vmatpush3.bf16.msra.mxu0 %v3397_v33 }
 0x195   : > { %3197 = vmatmul.mubr.f32.gmra.mrb[66].mxu1 %v4177_v43  ;;  %3399 = vmatprep.subr.bf16.mxu0 %v3618_v27 }
 0x196   : > { %3199 = vmatprep.mubr.msk.f32.mxu1 %vm3619_vm1, %v3620_v30 }
 0x198   : > { %3401 = vmatpush3.bf16.msra.mxu0 %v3400_v37 }
 0x199   : > { %3200 = vmatmul.mubr.f32.gmra.mrb[68].mxu1 %v1013_v54 }
 0x19a   : > { %3202 = vmatprep.mubr.msk.f32.mxu1 %vm3619_vm1, %v3620_v30 }
 0x19d   : > { %3203 = vmatmul.mubr.f32.gmra.mrb[70].mxu1 %v1014_v2 }
 0x19e   : > { %3205 = vmatprep.mubr.msk.f32.mxu1 %vm3619_vm1, %v3620_v30 }
 0x1a1   : > { %3206 = vmatmul.mubr.f32.gmra.mrb[72].mxu1 %v1015_v14 }
 0x1a2   : > { %3208 = vmatprep.mubr.msk.f32.mxu1 %vm3619_vm1, %v3620_v30 }
 0x1a5   : > { %3209 = vmatmul.mubr.f32.gmra.mrb[74].mxu1 %v1016_v24 }
 0x1a6   : > { %3211 = vmatprep.mubr.msk.f32.mxu1 %vm3619_vm1, %v3620_v30 }
 0x1a9   : > { %3212 = vmatmul.mubr.f32.gmra.mrb[76].mxu1 %v1017_v63 }
 0x1aa   : > { %3214 = vmatprep.mubr.msk.f32.mxu1 %vm3619_vm1, %v3620_v30 }
 0x1ad   : > { %3215 = vmatmul.mubr.f32.gmra.mrb[78].mxu1 %v1018_v23 }
 0x218   : > { %v1156_v39 = vpop.f32.mrb[26].mxu1 }
 0x219   : > { %v1296_v40 = vadd.f32 %v2826_v38, %v1156_v39  ;;  %v3138_v41 = vpop.f32.mrb[27].mxu1 }
 0x21b   : > { %v1299_v42 = vsub.f32 0.0, %v1296_v40 }
 0x21c   : > { %v1161_v43 = vpop.f32.mrb[28].mxu1 }
 0x21d   : > { %v1302_v27 = vmul.f32 1.442695, %v1299_v42  ;;  %v1297_v44 = vadd.f32 %v2826_v38, %v1161_v43  ;;  %v3141_v46 = vpop.f32.mrb[29].mxu1 }
 0x21f   : > { %3526 = vpow2.f32 %v1302_v27  ;;  %v1300_v47 = vsub.f32 0.0, %v1297_v44 }
 0x220   : > { %v1166_v49 = vpop.f32.mrb[30].mxu1 }
 0x221   : > { %v1304_v50 = vmul.f32 1.442695, %v1300_v47  ;;  %v1298_v51 = vadd.f32 %v2826_v38, %v1166_v49  ;;  %v3144_v52 = vpop.f32.mrb[31].mxu1 }
 0x223   : > { %3528 = vpow2.f32 %v1304_v50  ;;  %v1301_v53 = vsub.f32 0.0, %v1298_v51 }
 0x224   : > { %v1171_v54 = vpop.f32.mrb[32].mxu1 }
 0x225   : > { %v1306_v55 = vmul.f32 1.442695, %v1301_v53  ;;  %v3147_v56 = vpop.f32.mrb[33].mxu1  ;;  %v1344_v23 = vmul.f32 %v1171_v54, %v1171_v54 }
 0x227   : > { %3530 = vpow2.f32 %v1306_v55 }
 0x228   : > { %v1176_v57 = vpop.f32.mrb[34].mxu1 }
 0x229   : > { %v3527_v58 = vpop.eup %3526  ;;  %v3150_v61 = vpop.f32.mrb[35].mxu1  ;;  %v1345_v18 = vmul.f32 %v1176_v57, %v1176_v57 }
 0x22a   : > { %v1308_v62 = vadd.f32 1.0, %v3527_v58 }
 0x22c   : > { %3532 = vrcp.f32 %v1308_v62  ;;  %v1181_v0 = vpop.f32.mrb[36].mxu1 }
 0x22d   : > { %v3529_v1 = vpop.eup %3528  ;;  %v3153_v2 = vpop.f32.mrb[37].mxu1  ;;  %v1346_v44 = vmul.f32 %v1181_v0, %v1181_v0 }
 0x22e   : > { %v1309_v3 = vadd.f32 1.0, %v3529_v1 }
 0x230   : > { %3534 = vrcp.f32 %v1309_v3  ;;  %v1186_v4 = vpop.f32.mrb[38].mxu1 }
 0x231   : > { %v3531_v5 = vpop.eup %3530  ;;  %v3156_v6 = vpop.f32.mrb[39].mxu1  ;;  %v1347_v10 = vmul.f32 %v1186_v4, %v1186_v4 }
 0x232   : > { %v1310_v7 = vadd.f32 1.0, %v3531_v5 }
 0x234   : > { %3536 = vrcp.f32 %v1310_v7  ;;  %v1191_v8 = vpop.f32.mrb[40].mxu1 }
 0x235   : > { %v3159_v9 = vpop.f32.mrb[41].mxu1  ;;  %v1348_v21 = vmul.f32 %v1191_v8, %v1191_v8 }
 0x236   : > { %v3533_v12 = vpop.eup %3532 }
 0x237   : > { %v1317_v14 = vsub.f32 1.0, %v3533_v12  ;;  %v1323_v16 = vmul.f32 2.0, %v3533_v12  ;;  %3250 = vmatmul.mubr.f32.vlgmr.msra.gmra.mrb[28].mxu0 %v3533_v12 }
 0x238   : > { %v1196_v17 = vpop.f32.mrb[42].mxu1  ;;  %3252 = vmatprep.mubr.msk.f32.mxu0 %vm3619_vm1, %v3620_v30 }
 0x239   : > { %v4280_v13 = vmul.f32 %v3533_v12, %v1317_v14  ;;  %v1326_v19 = vsub.f32 1.0, %v1323_v16  ;;  %v3162_v20 = vpop.f32.mrb[43].mxu1  ;;  %v1349_v52 = vmul.f32 %v1196_v17, %v1196_v17 }
 0x23a   : > { %v3535_v22 = vpop.eup %3534 }
 0x23b   : > { %v1329_v24 = vmul.f32 %v1326_v19, %v4280_v13  ;;  %v1332_v25 = vmul.f32 %v4280_v13, %v1171_v54  ;;  %v1318_v26 = vsub.f32 1.0, %v3535_v22  ;;  %v1324_v29 = vmul.f32 2.0, %v3535_v22  ;;  %3253 = vmatmul.mubr.f32.gmra.mrb[30].mxu0 %v3535_v22 }
 0x23c   : > { %v1335_v35 = vmul.f32 %v4280_v13, %v1186_v4  ;;  %v1201_v63 = vpop.f32.mrb[44].mxu1  ;;  %3255 = vmatprep.mubr.msk.f32.mxu0 %vm3619_vm1, %v3620_v30 }
 0x23d   : > { %v4287_v45 = vmul.f32 %v1344_v23, %v1329_v24  ;;  %v4289_v48 = vmul.f32 %v3535_v22, %v1318_v26  ;;  %v1327_v59 = vsub.f32 1.0, %v1324_v29  ;;  %v4291_v60 = vmul.f32 %v1347_v10, %v1329_v24  ;;  %v3165_v11 = vpop.f32.mrb[45].mxu1 }
 0x23e   : > { %v3537_v15 = vpop.eup %3536  ;;  %v4294_v28 = vmul.f32 %v4280_v13, %v1201_v63  ;;  %v1350_v31 = vmul.f32 %v1201_v63, %v1201_v63 }
 0x23f   : > { %v1330_v32 = vmul.f32 %v1327_v59, %v4289_v48  ;;  %v1333_v33 = vmul.f32 %v4289_v48, %v1176_v57  ;;  %v1319_v34 = vsub.f32 1.0, %v3537_v15  ;;  %v1325_v36 = vmul.f32 2.0, %v3537_v15  ;;  %3256 = vmatmul.mubr.f32.gmra.mrb[32].mxu0 %v3537_v15 }
 0x240   : > { %v1336_v37 = vmul.f32 %v4289_v48, %v1191_v8  ;;  %v4299_v38 = vmul.f32 %v1350_v31, %v1329_v24  ;;  %v1206_v39 = vpop.f32.mrb[46].mxu1  ;;  %3258 = vmatprep.mubr.msk.f32.mxu0 %vm3619_vm1, %v3620_v30 }
 0x241   : > { %v1357_v40 = vmul.f32 %v1345_v18, %v1330_v32  ;;  %v4303_v41 = vmul.f32 %v3537_v15, %v1319_v34  ;;  %v1328_v42 = vsub.f32 1.0, %v1325_v36  ;;  %v4305_v43 = vmul.f32 %v1348_v21, %v1330_v32  ;;  %v3168_v27 = vpop.f32.mrb[47].mxu1 }
 0x242   : > { %v1339_v46 = vmul.f32 %v4289_v48, %v1206_v39  ;;  %v1351_v47 = vmul.f32 %v1206_v39, %v1206_v39 }
 0x243   : > { %v1331_v49 = vmul.f32 %v1328_v42, %v4303_v41  ;;  %v1334_v50 = vmul.f32 %v4303_v41, %v1181_v0  ;;  %v1337_v51 = vmul.f32 %v4303_v41, %v1196_v17  ;;  %3259 = vmatmul.mubr.f32.gmra.mrb[34].mxu0 %v1332_v25 }
 0x244   : > { %v4311_v53 = vmul.f32 %v1351_v47, %v1330_v32  ;;  %v1211_v54 = vpop.f32.mrb[48].mxu1  ;;  %3261 = vmatprep.mubr.msk.f32.mxu0 %vm3619_vm1, %v3620_v30 }
 0x245   : > { %v1358_v55 = vmul.f32 %v1346_v44, %v1331_v49  ;;  %v1361_v56 = vmul.f32 %v1349_v52, %v1331_v49  ;;  %v1340_v57 = vmul.f32 %v4303_v41, %v1211_v54  ;;  %v1352_v58 = vmul.f32 %v1211_v54, %v1211_v54  ;;  %v3171_v61 = vpop.f32.mrb[49].mxu1 }
 0x247   : > { %v4316_v62 = vmul.f32 %v1352_v58, %v1331_v49  ;;  %3262 = vmatmul.mubr.f32.gmra.mrb[36].mxu0 %v1333_v33 }
 0x248   : > { %v1216_v0 = vpop.f32.mrb[50].mxu1  ;;  %3264 = vmatprep.mubr.msk.f32.mxu0 %vm3619_vm1, %v3620_v30 }
 0x249   : > { %v1341_v1 = vmul.f32 %v4280_v13, %v1216_v0  ;;  %v1353_v2 = vmul.f32 %v1216_v0, %v1216_v0  ;;  %v3174_v3 = vpop.f32.mrb[51].mxu1 }
 0x24b   : > { %v4321_v4 = vmul.f32 %v1353_v2, %v1329_v24  ;;  %3265 = vmatmul.mubr.f32.gmra.mrb[38].mxu0 %v1334_v50 }
 0x24c   : > { %v1221_v5 = vpop.f32.mrb[52].mxu1  ;;  %3267 = vmatprep.mubr.msk.f32.mxu0 %vm3619_vm1, %v3620_v30 }
 0x24d   : > { %v1342_v6 = vmul.f32 %v4289_v48, %v1221_v5  ;;  %v1354_v7 = vmul.f32 %v1221_v5, %v1221_v5  ;;  %v3177_v8 = vpop.f32.mrb[53].mxu1 }
 0x24f   : > { %v4326_v9 = vmul.f32 %v1354_v7, %v1330_v32  ;;  %3268 = vmatmul.mubr.f32.gmra.mrb[40].mxu0 %v1335_v35 }
 0x250   : > { %v1226_v12 = vpop.f32.mrb[54].mxu1  ;;  %3270 = vmatprep.mubr.msk.f32.mxu0 %vm3619_vm1, %v3620_v30 }
 0x251   : > { %v1343_v14 = vmul.f32 %v4303_v41, %v1226_v12  ;;  %v1355_v16 = vmul.f32 %v1226_v12, %v1226_v12  ;;  %v3180_v17 = vpop.f32.mrb[55].mxu1 }
 0x253   : > { %v4331_v19 = vmul.f32 %v1355_v16, %v1331_v49  ;;  %3271 = vmatmul.mubr.f32.gmra.mrb[42].mxu0 %v1336_v37 }
 0x254   : > { %v1231_v20 = vpop.f32.mrb[56].mxu1  ;;  %3273 = vmatprep.mubr.msk.f32.mxu0 %vm3619_vm1, %v3620_v30 }
 0x255   : > { %v1368_v22 = vmul.f32 %v4280_v13, %v1231_v20  ;;  %v3183_v23 = vpop.f32.mrb[57].mxu1 }
 0x257   : > { %v1380_v10 = vadd.f32 %v1368_v22, %v4287_v45  ;;  %3274 = vmatmul.mubr.f32.gmra.mrb[44].mxu0 %v1337_v51 }
 0x258   : > { %v1236_v24 = vpop.f32.mrb[58].mxu1  ;;  %3276 = vmatprep.mubr.msk.f32.mxu0 %vm3619_vm1, %v3620_v30 }
 0x259   : > { %v1369_v25 = vmul.f32 %v4289_v48, %v1236_v24  ;;  %v3186_v26 = vpop.f32.mrb[59].mxu1 }
 0x25b   : > { %v1381_v29 = vadd.f32 %v1369_v25, %v1357_v40  ;;  %3277 = vmatmul.mubr.f32.gmra.mrb[46].mxu0 %v4294_v28 }
 0x25c   : > { %v1241_v35 = vpop.f32.mrb[60].mxu1  ;;  %3279 = vmatprep.mubr.msk.f32.mxu0 %vm3619_vm1, %v3620_v30 }
 0x25d   : > { %v1370_v63 = vmul.f32 %v4303_v41, %v1241_v35  ;;  %v3189_v59 = vpop.f32.mrb[61].mxu1 }
 0x25f   : > { %v1382_v11 = vadd.f32 %v1370_v63, %v1358_v55  ;;  %3280 = vmatmul.mubr.f32.gmra.mrb[48].mxu0 %v1339_v46 }
 0x260   : > { %v1246_v45 = vpop.f32.mrb[62].mxu1  ;;  %3282 = vmatprep.mubr.msk.f32.mxu0 %vm3619_vm1, %v3620_v30 }
 0x261   : > { %v1371_v15 = vmul.f32 %v4280_v13, %v1246_v45  ;;  %v3192_v18 = vpop.f32.mrb[63].mxu1 }
 0x263   : > { %v1383_v21 = vadd.f32 %v1371_v15, %v4291_v60  ;;  %3283 = vmatmul.mubr.f32.gmra.mrb[50].mxu0 %v1340_v57 }
 0x264   : > { %v1251_v28 = vpop.f32.mrb[64].mxu1  ;;  %3285 = vmatprep.mubr.msk.f32.mxu0 %vm3619_vm1, %v3620_v30 }
 0x265   : > { %v1372_v31 = vmul.f32 %v4289_v48, %v1251_v28  ;;  %v3195_v32 = vpop.f32.mrb[65].mxu1 }
 0x267   : > { %v1384_v33 = vadd.f32 %v1372_v31, %v4305_v43  ;;  %3286 = vmatmul.mubr.f32.gmra.mrb[52].mxu0 %v1341_v1  ;;  %v3622_v31 = vmov 2475754826  }
 0x268   : > { %v1256_v34 = vpop.f32.mrb[66].mxu1  ;;  %3288 = vmatprep.mubr.msk.f32.mxu0 %vm3619_vm1, %v3620_v30 }
 0x269   : > { %v1373_v36 = vmul.f32 %v4303_v41, %v1256_v34  ;;  %v3198_v37 = vpop.f32.mrb[67].mxu1  ;;  %v3623_v34 = vmov 2131351028  }
 0x26a   : > { %v3624_v37 = vmov 2102212464  }
 0x26b   : > { %v1385_v39 = vadd.f32 %v1373_v36, %v1361_v56  ;;  %3289 = vmatmul.mubr.f32.gmra.mrb[54].mxu0 %v1342_v6 }
 0x26c   : > { %v1261_v60 = vpop.f32.mrb[68].mxu1  ;;  %3291 = vmatprep.mubr.msk.f32.mxu0 %vm3619_vm1, %v3620_v30 }
 0x26d   : > { %v1374_v40 = vmul.f32 %v4280_v13, %v1261_v60  ;;  %v3201_v42 = vpop.f32.mrb[69].mxu1  ;;  %v3625_v60 = vmov 920167782  }
 0x26f   : > { %v1386_v27 = vadd.f32 %v1374_v40, %v4299_v38  ;;  %3292 = vmatmul.mubr.f32.gmra.mrb[56].mxu0 %v1343_v14 }
 0x270   : > { %v1266_v43 = vpop.f32.mrb[70].mxu1  ;;  %3294 = vmatprep.mubr.msk.f32.mxu0 %vm3619_vm1, %v3620_v30 }
 0x271   : > { %v1375_v44 = vmul.f32 %v4289_v48, %v1266_v43  ;;  %v3204_v46 = vpop.f32.mrb[71].mxu1 }
 0x273   : > { %v1387_v47 = vadd.f32 %v1375_v44, %v4311_v53  ;;  %3295 = vmatmul.mubr.f32.gmra.mrb[58].mxu0 %v1380_v10 }
 0x274   : > { %v1271_v49 = vpop.f32.mrb[72].mxu1  ;;  %3297 = vmatprep.mubr.msk.f32.mxu0 %vm3619_vm1, %v3620_v30 }
 0x275   : > { %v1376_v50 = vmul.f32 %v4303_v41, %v1271_v49  ;;  %v3207_v51 = vpop.f32.mrb[73].mxu1 }
 0x277   : > { %v1388_v38 = vadd.f32 %v1376_v50, %v4316_v62  ;;  %3298 = vmatmul.mubr.f32.gmra.mrb[60].mxu0 %v1381_v29  ;;  %v3626_v50 = vmov 1326507024  }
 0x278   : > { %v1276_v52 = vpop.f32.mrb[74].mxu1  ;;  %3300 = vmatprep.mubr.msk.f32.mxu0 %vm3619_vm1, %v3620_v30 }
 0x279   : > { %v1377_v54 = vmul.f32 %v4280_v13, %v1276_v52  ;;  %v3210_v55 = vpop.f32.mrb[75].mxu1 }
 0x27b   : > { %v1389_v53 = vadd.f32 %v1377_v54, %v4321_v4  ;;  %3301 = vmatmul.mubr.f32.gmra.mrb[62].mxu0 %v1382_v11 }
 0x27c   : > { %v1281_v56 = vpop.f32.mrb[76].mxu1  ;;  %3303 = vmatprep.mubr.msk.f32.mxu0 %vm3619_vm1, %v3620_v30 }
 0x27d   : > { %v1378_v57 = vmul.f32 %v4289_v48, %v1281_v56  ;;  %v3213_v58 = vpop.f32.mrb[77].mxu1  ;;  %v2827_v48 = vld [vmem:[%s5000_s8] ss:$0 sm:$0xff] }
 0x27f   : > { %v1390_v61 = vadd.f32 %v1378_v57, %v4326_v9  ;;  %3304 = vmatmul.mubr.f32.gmra.mrb[64].mxu0 %v1383_v21  ;;  %v3621_v21 = vmov 683565275  }
 0x280   : > { %v1286_v62 = vpop.f32.mrb[78].mxu1  ;;  %3306 = vmatprep.mubr.msk.f32.mxu0 %vm3619_vm1, %v3620_v30 }
 0x281   : > { %v1379_v13 = vmul.f32 %v4303_v41, %v1286_v62  ;;  %v3216_v0 = vpop.f32.mrb[79].mxu1 }
 0x283   : > { %v1391_v1 = vadd.f32 %v1379_v13, %v4331_v19  ;;  %3307 = vmatmul.mubr.f32.gmra.mrb[66].mxu0 %v1384_v33 }
 0x284   : > { %3309 = vmatprep.mubr.msk.f32.mxu0 %vm3619_vm1, %v3620_v30 }
 0x287   : > { %3310 = vmatmul.mubr.f32.gmra.mrb[68].mxu0 %v1385_v39 }
 0x288   : > { %3312 = vmatprep.mubr.msk.f32.mxu0 %vm3619_vm1, %v3620_v30 }
 0x28b   : > { %3313 = vmatmul.mubr.f32.gmra.mrb[70].mxu0 %v1386_v27 }
 0x28c   : > { %3315 = vmatprep.mubr.msk.f32.mxu0 %vm3619_vm1, %v3620_v30 }
 0x28f   : > { %3316 = vmatmul.mubr.f32.gmra.mrb[72].mxu0 %v1387_v47 }
 0x290   : > { %3318 = vmatprep.mubr.msk.f32.mxu0 %vm3619_vm1, %v3620_v30 }
 0x293   : > { %3319 = vmatmul.mubr.f32.gmra.mrb[74].mxu0 %v1388_v38 }
 0x294   : > { %3321 = vmatprep.mubr.msk.f32.mxu0 %vm3619_vm1, %v3620_v30 }
 0x297   : > { %3322 = vmatmul.mubr.f32.gmra.mrb[76].mxu0 %v1389_v53 }
 0x298   : > { %3324 = vmatprep.mubr.msk.f32.mxu0 %vm3619_vm1, %v3620_v30 }
 0x29b   : > { %3325 = vmatmul.mubr.f32.gmra.mrb[78].mxu0 %v1390_v61 }
 0x29c   : > { %3327 = vmatprep.mubr.msk.f32.mxu0 %vm3619_vm1, %v3620_v30 }
 0x29f   : > { %3328 = vmatmul.mubr.f32.gmra.mrb[80].mxu0 %v1391_v1 }
 0x30a   : > { %v1529_v41 = vpop.f32.mrb[28].mxu0 }
 0x30b   : > { %v4396_v2 = vadd.f32 %v2827_v48, %v1529_v41  ;;  %v3251_v3 = vpop.f32.mrb[29].mxu0 }
 0x30d   : > { %v1672_v4 = vand.u32 2147483647, %v4396_v2  ;;  %v1675_v5 = vand.u32 2139095040, %v4396_v2 }
 0x30e   : > { %v1534_v6 = vpop.f32.mrb[30].mxu0 }
 0x30f   : > { %v1676_v7 = vshrl.u32 %v1675_v5, 23  ;;  %v4400_v8 = vadd.f32 %v2827_v48, %v1534_v6  ;;  %v3254_v9 = vpop.f32.mrb[31].mxu0  ;;  %v1679_v30 = vand.u32 8388607, %v1672_v4 }
 0x311   : > { %v2828_v12 = vadd.s32 4294967169, %v1676_v7  ;;  %v1776_v14 = vand.u32 2147483647, %v4400_v8  ;;  %v1779_v16 = vand.u32 2139095040, %v4400_v8  ;;  %v1680_v20 = vor.u32 8388608, %v1679_v30 }
 0x312   : > { %v1539_v17 = vpop.f32.mrb[32].mxu0 }
 0x313   : > { %v1682_v19 = vadd.s32 1, %v2828_v12  ;;  %v1780_v22 = vshrl.u32 %v1779_v16, 23  ;;  %v4408_v23 = vand.u32 8388607, %v1776_v14  ;;  %v4410_v10 = vadd.f32 %v2827_v48, %v1539_v17  ;;  %v3257_v24 = vpop.f32.mrb[33].mxu0 }
 0x314   : > { %v4415_v11 = vshll.u32 %v1680_v20, 8 }
 0x315   : > { %vm1683_vm3 = vcmp.gt.s32.totalorder %v1682_v19, 0  ;;  %v2832_v26 = vadd.s32 4294967169, %v1780_v22  ;;  %v1784_v45 = vor.u32 8388608, %v4408_v23  ;;  %v1883_v15 = vand.u32 2139095040, %v4410_v10 }
 0x316   : > { %v1684_v25 = vsel %vm1683_vm3, %v1682_v19, 0  ;;  %v4413_v29 = vpop.f32.mrb[34].mxu0  ;;  %v1880_v16 = vand.u32 2147483647, %v4410_v10 }
 0x317   : > { %v1685_v35 = vshrl.u32 %v1684_v25, 5  ;;  %v1686_v63 = vand.u32 31, %v1684_v25  ;;  %v3260_v59 = vpop.f32.mrb[35].mxu0  ;;  %v1786_v33 = vadd.s32 1, %v2832_v26 }
 0x319   : > { %v1687_v18 = vsub.s32 32, %v1686_v63  ;;  %v1689_v28 = vshll.u32 %v3621_v21, %v1686_v63  ;;  %v1692_v32 = vshll.u32 %v3622_v31, %v1686_v63  ;;  %v1695_v36 = vshll.u32 %v3623_v34, %v1686_v63 }
 0x31a   : > { %v1698_v39 = vshll.u32 %v3624_v37, %v1686_v63  ;;  %v1701_v40 = vshll.u32 %v3625_v60, %v1686_v63  ;;  %vm1704_vm4 = vcmp.lt.s32.totalorder %v1685_v35, 1  ;;  %v4424_v42 = vpop.f32.mrb[36].mxu0  ;;  %vm1705_vm5 = vcmp.lt.s32.totalorder %v1685_v35, 2 }
 0x31b   : > { %v1690_v27 = vshrl.u32 %v3622_v31, %v1687_v18  ;;  %v1693_v43 = vshrl.u32 %v3623_v34, %v1687_v18  ;;  %v1696_v44 = vshrl.u32 %v3624_v37, %v1687_v18  ;;  %v3263_v46 = vpop.f32.mrb[37].mxu0  ;;  %v1688_v47 = vshrl.u32 %v3621_v21, %v1687_v18 }
 0x31c   : > { %v1699_v49 = vshrl.u32 %v3625_v60, %v1687_v18  ;;  %v1702_v51 = vshrl.u32 %v3626_v50, %v1687_v18  ;;  %vm1706_vm6 = vcmp.lt.s32.totalorder %v1685_v35, 3  ;;  %vm1787_vm7 = vcmp.gt.s32.totalorder %v1786_v33, 0 }
 0x31d   : > { %v1691_v38 = vor.u32 %v1690_v27, %v1689_v28  ;;  %v1694_v52 = vor.u32 %v1693_v43, %v1692_v32  ;;  %v1697_v54 = vor.u32 %v1696_v44, %v1695_v36  ;;  %vm1707_vm8 = vcmp.lt.s32.totalorder %v1685_v35, 4 }
 0x31e   : > { %v1700_v55 = vor.u32 %v1699_v49, %v1698_v39  ;;  %v1703_v53 = vor.u32 %v1702_v51, %v1701_v40  ;;  %v1788_v56 = vsel %vm1787_vm7, %v1786_v33, 0  ;;  %v4432_v57 = vpop.f32.mrb[38].mxu0  ;;  %v4458_v63 = vshll.u32 %v1784_v45, 8 }
 0x31f   : > { %v1708_v58 = vsel %vm1704_vm4, %v1688_v47, %v1691_v38  ;;  %v1709_v61 = vsel %vm1707_vm8, %v1697_v54, 2102212464  ;;  %v1712_v62 = vsel %vm1704_vm4, %v1691_v38, %v1694_v52  ;;  %v1716_v13 = vsel %vm1704_vm4, %v1694_v52, %v1697_v54  ;;  %v3266_v0 = vpop.f32.mrb[39].mxu0 }
 0x320   : > { %v1710_v1 = vsel %vm1706_vm6, %v1694_v52, %v1709_v61  ;;  %v1713_v48 = vsel %vm1707_vm8, %v1700_v55, 920167782  ;;  %v1717_v41 = vsel %vm1707_vm8, %v1703_v53, 1326507024  ;;  %v4438_v3 = vshrl.u32 %v1788_v56, 5 }
 0x321   : > { %v1711_v5 = vsel %vm1705_vm5, %v1708_v58, %v1710_v1  ;;  %v1714_v6 = vsel %vm1706_vm6, %v1697_v54, %v1713_v48  ;;  %v1718_v7 = vsel %vm1706_vm6, %v1700_v55, %v1717_v41  ;;  %v1790_v9 = vand.u32 31, %v1788_v56 }
 0x322   : > { %v1715_v30 = vsel %vm1705_vm5, %v1712_v62, %v1714_v6  ;;  %v1719_v12 = vsel %vm1705_vm5, %v1716_v13, %v1718_v7  ;;  %v4446_v17 = vpop.f32.mrb[40].mxu0  ;;  %v1727_v25 = vmul.u32 %v4415_v11, %v1711_v5  ;;  %v1884_v35 = vshrl.u32 %v1883_v15, 23 }
 0x323   : > { %v4449_v19 = vmul.u32.u64.low %v4415_v11, %v1719_v12  ;;  %v4450_v20 = vmul.u32.u64.high %v4415_v11, %v1719_v12, %v4449_v19  ;;  %v4453_v22 = vmul.u32.u64.low %v4415_v11, %v1715_v30  ;;  %v4454_v23 = vmul.u32.u64.high %v4415_v11, %v1715_v30, %v4453_v22  ;;  %v3269_v24 = vpop.f32.mrb[41].mxu0 }
 0x324   : > { %v1791_v26 = vsub.s32 32, %v1790_v9  ;;  %v1793_v59 = vshll.u32 %v3621_v21, %v1790_v9  ;;  %v1796_v18 = vshll.u32 %v3622_v31, %v1790_v9  ;;  %v1799_v28 = vshll.u32 %v3623_v34, %v1790_v9 }
 0x325   : > { %vm1808_vm9 = vcmp.lt.s32.totalorder %v4438_v3, 1  ;;  %v1802_v11 = vshll.u32 %v3624_v37, %v1790_v9  ;;  %vm1729_vm10 = vc.u32 %v4450_v20, %v4453_v22  ;;  %v1730_v45 = vadd.s32 1, %v4454_v23 }
 0x326   : > { %v1794_v32 = vshrl.u32 %v3622_v31, %v1791_v26  ;;  %v1797_v33 = vshrl.u32 %v3623_v34, %v1791_v26  ;;  %v1800_v36 = vshrl.u32 %v3624_v37, %v1791_v26  ;;  %v4468_v39 = vpop.f32.mrb[42].mxu0  ;;  %v1803_v15 = vshrl.u32 %v3625_v60, %v1791_v26 }
 0x327   : > { %v1805_v40 = vshll.u32 %v3625_v60, %v1790_v9  ;;  %v3272_v27 = vpop.f32.mrb[43].mxu0  ;;  %v1806_v47 = vshrl.u32 %v3626_v50, %v1791_v26  ;;  %v1731_v49 = vsel %vm1729_vm10, %v1730_v45, %v4454_v23  ;;  %vm1810_vm11 = vcmp.lt.s32.totalorder %v4438_v3, 3 }
 0x328   : > { %v1795_v43 = vor.u32 %v1794_v32, %v1793_v59  ;;  %v1798_v44 = vor.u32 %v1797_v33, %v1796_v18  ;;  %v1801_v46 = vor.u32 %v1800_v36, %v1799_v28  ;;  %v1804_v51 = vor.u32 %v1803_v15, %v1802_v11 }
 0x329   : > { %vm1811_vm12 = vcmp.lt.s32.totalorder %v4438_v3, 4  ;;  %v1732_v38 = vadd.s32 %v1731_v49, %v1727_v25  ;;  %v1792_v52 = vshrl.u32 %v3621_v21, %v1791_v26  ;;  %v1807_v54 = vor.u32 %v1806_v47, %v1805_v40 }
 0x32a   : > { %v1813_v55 = vsel %vm1811_vm12, %v1801_v46, 2102212464  ;;  %v4480_v53 = vpop.f32.mrb[44].mxu0  ;;  %v1816_v56 = vsel %vm1808_vm9, %v1795_v43, %v1798_v44  ;;  %v1817_v58 = vsel %vm1811_vm12, %v1804_v51, 920167782  ;;  %v1820_v61 = vsel %vm1808_vm9, %v1798_v44, %v1801_v46 }
 0x32b   : > { %v2836_v62 = vadd.s32 4294967169, %v1884_v35  ;;  %v3275_v13 = vpop.f32.mrb[45].mxu0  ;;  %v1733_v0 = vadd.s32 536870912, %v1732_v38  ;;  %vm1809_vm13 = vcmp.lt.s32.totalorder %v4438_v3, 2  ;;  %v1818_v1 = vsel %vm1810_vm11, %v1801_v46, %v1817_v58 }
 0x32c   : > { %v1821_v48 = vsel %vm1811_vm12, %v1807_v54, 1326507024  ;;  %v1812_v41 = vsel %vm1808_vm9, %v1792_v52, %v1795_v43  ;;  %v1814_v5 = vsel %vm1810_vm11, %v1798_v44, %v1813_v55  ;;  %v1819_v6 = vsel %vm1809_vm13, %v1816_v56, %v1818_v1 }
 0x32d   : > { %v1822_v7 = vsel %vm1810_vm11, %v1804_v51, %v1821_v48  ;;  %v4495_v9 = vshrl.u32 %v1733_v0, 30  ;;  %v4498_v12 = vmul.u32.u64.low %v4458_v63, %v1819_v6  ;;  %v4499_v19 = vmul.u32.u64.high %v4458_v63, %v1819_v6, %v4498_v12 }
 0x32e   : > { %v1823_v30 = vsel %vm1809_vm13, %v1820_v61, %v1822_v7  ;;  %v4502_v23 = vpop.f32.mrb[46].mxu0  ;;  %v1890_v26 = vadd.s32 1, %v2836_v62  ;;  %v1815_v3 = vsel %vm1809_vm13, %v1812_v41, %v1814_v5  ;;  %v1887_v32 = vand.u32 8388607, %v1880_v16 }
 0x32f   : > { %v4505_v24 = vmul.u32.u64.low %v4458_v63, %v1823_v30  ;;  %v4506_v25 = vmul.u32.u64.high %v4458_v63, %v1823_v30, %v4505_v24  ;;  %v3278_v35 = vpop.f32.mrb[47].mxu0  ;;  %v1735_v59 = vshll.u32 %v4495_v9, 30  ;;  %v1834_v28 = vadd.s32 1, %v4499_v19 }
 0x330   : > { %vm1891_vm14 = vcmp.gt.s32.totalorder %v1890_v26, 0  ;;  %v1831_v11 = vmul.u32 %v4458_v63, %v1815_v3  ;;  %v1888_v46 = vor.u32 8388608, %v1887_v32  ;;  %v1728_v63 = vadd.s32 %v4453_v22, %v4450_v20 }
 0x331   : > { %v1736_v18 = vsub.s32 %v1732_v38, %v1735_v59  ;;  %v1892_v33 = vsel %vm1891_vm14, %v1890_v26, 0  ;;  %vm1833_vm15 = vc.u32 %v4506_v25, %v4498_v12  ;;  %vm1674_vm6 = vcmp.lt.s32.totalorder %v4396_v2, 0 }
 0x332   : > { %v4512_v36 = vpop.f32.mrb[48].mxu0  ;;  %v1835_v40 = vsel %vm1833_vm15, %v1834_v28, %v4499_v19  ;;  %v1894_v43 = vand.u32 31, %v1892_v33  ;;  %v4518_v47 = vshrl.u32 %v1892_v33, 5  ;;  %v4528_v61 = vshll.u32 %v1888_v46, 8 }
 0x333   : > { %v3281_v45 = vpop.f32.mrb[49].mxu0  ;;  %v1738_v15 = vsub.s32 0, %v1736_v18  ;;  %v1836_v27 = vadd.s32 %v1835_v40, %v1831_v11  ;;  %vm4595_vm8 = vcmp.le.f32.partialorder %v1672_v4, 0.7853982  ;;  %vm1778_vm9 = vcmp.lt.s32.totalorder %v4400_v8, 0 }
 0x334   : > { %v1895_v38 = vsub.s32 32, %v1894_v43  ;;  %vm1912_vm0 = vcmp.lt.s32.totalorder %v4518_v47, 1  ;;  %v1897_v22 = vshll.u32 %v3621_v21, %v1894_v43  ;;  %v1900_v41 = vshll.u32 %v3622_v31, %v1894_v43 }
 0x335   : > { %v2829_v44 = vmin.u32 %v1738_v15, %v1736_v18  ;;  %v1837_v51 = vadd.s32 536870912, %v1836_v27  ;;  %v1903_v5 = vshll.u32 %v3623_v34, %v1894_v43  ;;  %v1906_v30 = vshll.u32 %v3624_v37, %v1894_v43 }
 0x336   : > { %v4520_v49 = vpop.f32.mrb[50].mxu0  ;;  %v1904_v58 = vshrl.u32 %v3624_v37, %v1895_v38  ;;  %v1898_v0 = vshrl.u32 %v3622_v31, %v1895_v38  ;;  %v1901_v1 = vshrl.u32 %v3623_v34, %v1895_v38  ;;  %v1907_v48 = vshrl.u32 %v3625_v60, %v1895_v38 }
 0x337   : > { %v3284_v52 = vpop.f32.mrb[51].mxu0  ;;  %v1740_v54 = vclz %v2829_v44  ;;  %v4524_v55 = vshrl.u32 %v1837_v51, 30  ;;  %v1910_v19 = vshrl.u32 %v3626_v50, %v1895_v38  ;;  %v1909_v59 = vshll.u32 %v3625_v60, %v1894_v43 }
 0x338   : > { %v1905_v35 = vor.u32 %v1904_v58, %v1903_v5  ;;  %v1899_v32 = vor.u32 %v1898_v0, %v1897_v22  ;;  %v1902_v31 = vor.u32 %v1901_v1, %v1900_v41  ;;  %v1908_v33 = vor.u32 %v1907_v48, %v1906_v30 }
 0x339   : > { %v2830_v56 = vadd.s32 4294967294, %v1740_v54  ;;  %v1839_v13 = vshll.u32 %v4524_v55, 30  ;;  %vm1913_vm3 = vcmp.lt.s32.totalorder %v4518_v47, 2  ;;  %v1896_v50 = vshrl.u32 %v3621_v21, %v1895_v38 }
 0x33a   : > { %v4530_v62 = vpop.f32.mrb[52].mxu0  ;;  %v1911_v40 = vor.u32 %v1910_v19, %v1909_v59  ;;  %vm1915_vm4 = vcmp.lt.s32.totalorder %v4518_v47, 4  ;;  %vm1914_vm5 = vcmp.lt.s32.totalorder %v4518_v47, 3  ;;  %v1920_v51 = vsel %vm1912_vm0, %v1899_v32, %v1902_v31 }
 0x33b   : > { %v3287_v20 = vpop.f32.mrb[53].mxu0  ;;  %vm2831_vm1 = vcmp.lt.s32.totalorder %v2830_v56, 0  ;;  %v4539_v7 = vsub.s32 %v1836_v27, %v1839_v13  ;;  %v1917_v43 = vsel %vm1915_vm4, %v1905_v35, 2102212464  ;;  %v1916_v46 = vsel %vm1912_vm0, %v1896_v50, %v1899_v32 }
 0x33c   : > { %v1743_v6 = vsel %vm2831_vm1, 0, %v2830_v56  ;;  %v1921_v21 = vsel %vm1915_vm4, %v1908_v33, 920167782  ;;  %v1924_v0 = vsel %vm1912_vm0, %v1902_v31, %v1905_v35  ;;  %v1925_v1 = vsel %vm1915_vm4, %v1911_v40, 1326507024 }
 0x33d   : > { %v1744_v24 = vsub.s32 32, %v1743_v6  ;;  %v1748_v26 = vsub.s32 4294967266, %v1743_v6  ;;  %v1842_v28 = vsub.s32 0, %v4539_v7  ;;  %v1745_v11 = vshll.u32 %v1736_v18, %v1743_v6 }
 0x33e   : > { %v4544_v3 = vpop.f32.mrb[54].mxu0  ;;  %v1922_v56 = vsel %vm1914_vm5, %v1905_v35, %v1921_v21  ;;  %v1926_v20 = vsel %vm1914_vm5, %v1908_v33, %v1925_v1  ;;  %v1758_v6 = vsub.s32 4, %v4495_v9  ;;  %vm4626_vm11 = vcmp.le.f32.partialorder %v1776_v14, 0.7853982 }
 0x33f   : > { %v3290_v34 = vpop.f32.mrb[55].mxu0  ;;  %v1746_v45 = vshrl.u32 %v1728_v63, %v1744_v24  ;;  %v1749_v15 = vadd.s32 127, %v1748_v26  ;;  %v2833_v37 = vmin.u32 %v1842_v28, %v4539_v7  ;;  %v1918_v63 = vsel %vm1914_vm5, %v1902_v31, %v1917_v43 }
 0x340   : > { %v1923_v13 = vsel %vm1913_vm3, %v1920_v51, %v1922_v56  ;;  %v1927_v30 = vsel %vm1913_vm3, %v1924_v0, %v1926_v20  ;;  %v1832_v28 = vadd.s32 %v4498_v12, %v4506_v25  ;;  %v1919_v33 = vsel %vm1913_vm3, %v1916_v46, %v1918_v63 }
 0x341   : > { %v1747_v60 = vor.u32 %v1746_v45, %v1745_v11  ;;  %v1750_v27 = vshll.u32 %v1749_v15, 23  ;;  %v1844_v18 = vclz %v2833_v37  ;;  %v1862_v45 = vsub.s32 4, %v4524_v55 }
 0x342   : > { %v4554_v44 = vpop.f32.mrb[56].mxu0  ;;  %v4575_v22 = vmul.u32.u64.low %v4528_v61, %v1923_v13  ;;  %v4576_v41 = vmul.u32.u64.high %v4528_v61, %v1923_v13, %v4575_v22  ;;  %v4586_v35 = vmul.u32.u64.low %v4528_v61, %v1927_v30  ;;  %v4587_v59 = vmul.u32.u64.high %v4528_v61, %v1927_v30, %v4586_v35 }
 0x343   : > { %v3293_v38 = vpop.f32.mrb[57].mxu0  ;;  %v1751_v52 = vor.u32 4788187, %v1750_v27  ;;  %v1754_v54 = vcvt.s32.f32 %v1747_v60  ;;  %v2834_v58 = vadd.s32 4294967294, %v1844_v18  ;;  %v1759_v12 = vsel %vm1674_vm6, %v1758_v6, %v4495_v9 }
 0x344   : > { %v1938_v15 = vadd.s32 1, %v4576_v41  ;;  %v1935_v60 = vmul.u32 %v4528_v61, %v1919_v33  ;;  %vm1937_vm10 = vc.u32 %v4587_v59, %v4575_v22  ;;  %v1761_v18 = vsel %vm4595_vm8, 0, %v1759_v12 }
 0x345   : > { %v1752_v48 = vand.u32 2147483647, %v1751_v52  ;;  %vm2835_vm7 = vcmp.lt.s32.totalorder %v2834_v58, 0  ;;  %v1863_v46 = vsel %vm1778_vm9, %v1862_v45, %v4524_v55  ;;  %v1765_v63 = vadd.s32 3, %v1761_v18 }
 0x346   : > { %v4579_v5 = vpop.f32.mrb[58].mxu0  ;;  %v1847_v26 = vsel %vm2835_vm7, 0, %v2834_v58  ;;  %v1865_v13 = vsel %vm4626_vm11, 0, %v1863_v46  ;;  %v2077_v1 = vand.u32 3, %v1761_v18  ;;  %vm1764_vm12 = vweird.f32 %v4396_v2 }
 0x347   : > { %v3296_v19 = vpop.f32.mrb[59].mxu0  ;;  %v1755_v24 = vmul.f32 %v1754_v54, %v1752_v48  ;;  %v1848_v32 = vsub.s32 32, %v1847_v26  ;;  %v1852_v31 = vsub.s32 4294967266, %v1847_v26  ;;  %v1849_v25 = vshll.u32 %v4539_v7, %v1847_v26 }
 0x348   : > { %v1939_v7 = vsel %vm1937_vm10, %v1938_v15, %v4576_v41  ;;  %v1869_v41 = vadd.s32 3, %v1865_v13  ;;  %v1766_v6 = vand.u32 3, %v1765_v63  ;;  %v4640_v19 = vmul.f32 %v4413_v29, %v4413_v29 }
 0x349   : > { %v1756_v11 = vxor.u32 2147483648, %v1755_v24  ;;  %v1850_v47 = vshrl.u32 %v1832_v28, %v1848_v32  ;;  %v1853_v50 = vadd.s32 127, %v1852_v31  ;;  %v1940_v61 = vadd.s32 %v1939_v7, %v1935_v60 }
 0x34a   : > { %v4601_v37 = vpop.f32.mrb[60].mxu0  ;;  %v4646_v26 = vmul.f32 %v4424_v42, %v4424_v42  ;;  %v4650_v35 = vmul.f32 %v4446_v17, %v4446_v17  ;;  %v4654_v28 = vmul.f32 %v4468_v39, %v4468_v39  ;;  %vm2078_vm13 = vcmp.lt.s32.totalorder %v2077_v1, 2 }
 0x34b   : > { %v3299_v40 = vpop.f32.mrb[61].mxu0  ;;  %v1757_v4 = vsel %vm1674_vm6, %v1756_v11, %v1755_v24  ;;  %v1851_v9 = vor.u32 %v1850_v47, %v1849_v25  ;;  %v1854_v43 = vshll.u32 %v1853_v50, 23  ;;  %v1941_v54 = vadd.s32 536870912, %v1940_v61 }
 0x34c   : > { %v1760_v27 = vsel %vm4595_vm8, %v4396_v2, %v1757_v4  ;;  %vm2079_vm14 = vcmp.eq.s32.totalorder %v2077_v1, 0  ;;  %vm2082_vm15 = vcmp.eq.s32.totalorder %v2077_v1, 2  ;;  %v4663_v45 = vand.u32 3, %v1869_v41  ;;  %v2407_v1 = vld [vmem:[%s3874_s30] sm:$0xff] }
 0x34d   : > { %3538 = vcosq.f32 %v1760_v27  ;;  %v1855_v21 = vor.u32 4788187, %v1854_v43  ;;  %v1858_v58 = vcvt.s32.f32 %v1851_v9  ;;  %v4632_v55 = vshrl.u32 %v1941_v54, 30 }
 0x34e   : > { %v4622_v51 = vpop.f32.mrb[62].mxu0  ;;  %3540 = vsinq.f32 %v1760_v27  ;;  %v4665_v15 = vand.u32 3, %v1865_v13  ;;  %vm1767_vm0 = vcmp.lt.s32.totalorder %v1766_v6, 2  ;;  %vm1768_vm1 = vcmp.eq.s32.totalorder %v1766_v6, 0 }
 0x34f   : > { %v3302_v38 = vpop.f32.mrb[63].mxu0  ;;  %v1856_v56 = vand.u32 2147483647, %v1855_v21  ;;  %v1943_v14 = vshll.u32 %v4632_v55, 30  ;;  %vm1771_vm3 = vcmp.eq.s32.totalorder %v1766_v6, 2  ;;  %v4674_v27 = vadd.s32 %v4575_v22, %v4587_v59  ;;  %v2410_v6 = vld [vmem:[%s3874_s30 + $0x18] sm:$0xff] }
 0x350   : > { %v2314_v9 = vmul.f32 %v4502_v23, %v4502_v23  ;;  %v4680_v43 = vmul.f32 %v4512_v36, %v4512_v36  ;;  %vm1882_vm4 = vcmp.lt.s32.totalorder %v4410_v10, 0  ;;  %v2386_v38 = vld [vmem:[%s3887_s16] sm:$0xff]  ;;  %vm2185_vm5 = vcmp.eq.s32.totalorder %v4665_v15, 2 }
 0x351   : > { %v1859_v48 = vmul.f32 %v1858_v58, %v1856_v56  ;;  %v4642_v24 = vsub.s32 %v1940_v61, %v1943_v14  ;;  %vm1875_vm6 = vcmp.eq.s32.totalorder %v4663_v45, 2  ;;  %v2317_v52 = vmul.f32 %v4530_v62, %v4530_v62 }
 0x352   : > { %v4634_v0 = vpop.f32.mrb[64].mxu0  ;;  %v4693_v54 = vmul.f32 %v4544_v3, %v4544_v3  ;;  %vm2182_vm7 = vcmp.eq.s32.totalorder %v4665_v15, 0  ;;  %v1966_v58 = vsub.s32 4, %v4632_v55  ;;  %vm1872_vm8 = vcmp.eq.s32.totalorder %v4663_v45, 0 }
 0x353   : > { %v3305_v20 = vpop.f32.mrb[65].mxu0  ;;  %v1860_v30 = vxor.u32 2147483648, %v1859_v48  ;;  %v1946_v12 = vsub.s32 0, %v4642_v24  ;;  %vm1871_vm10 = vcmp.lt.s32.totalorder %v4663_v45, 2 }
 0x355   : > { %v1861_v31 = vsel %vm1778_vm9, %v1860_v30, %v1859_v48  ;;  %v2837_v40 = vmin.u32 %v1946_v12, %v4642_v24  ;;  %vm2181_vm9 = vcmp.lt.s32.totalorder %v4665_v15, 2 }
 0x356   : > { %v4656_v32 = vpop.f32.mrb[66].mxu0  ;;  %v1864_v11 = vsel %vm4626_vm11, %v4400_v8, %v1861_v31  ;;  %vm1868_vm11 = vweird.f32 %v4400_v8 }
 0x357   : > { %v3308_v33 = vpop.f32.mrb[67].mxu0  ;;  %v3539_v34 = vpop.eup %3538  ;;  %3542 = vcosq.f32 %v1864_v11  ;;  %v1948_v46 = vclz %v2837_v40 }
 0x358   : > { %v3541_v25 = vpop.eup %3540  ;;  %v1772_v47 = vxor.u32 2147483648, %v3539_v34  ;;  %3544 = vsinq.f32 %v1864_v11  ;;  %v2413_v33 = vld [vmem:[%s3874_s30 + $0x30] sm:$0xff] }
 0x359   : > { %v1769_v50 = vxor.u32 2147483648, %v3541_v25  ;;  %v2838_v56 = vadd.s32 4294967294, %v1948_v46 }
 0x35a   : > { %v4669_v4 = vpop.f32.mrb[68].mxu0  ;;  %v2084_v60 = vsel %vm2082_vm15, %v1772_v47, %v3541_v25  ;;  %v1773_v21 = vsel %vm1771_vm3, %v1772_v47, %v3541_v25 }
 0x35b   : > { %v3311_v7 = vpop.f32.mrb[69].mxu0  ;;  %v2081_v18 = vsel %vm2079_vm14, %v3539_v34, %v1769_v50  ;;  %v1770_v61 = vsel %vm1768_vm1, %v3539_v34, %v1769_v50  ;;  %vm1972_vm14 = vweird.f32 %v4410_v10 }
 0x35c   : > { %v2085_v22 = vsel %vm2078_vm13, %v2081_v18, %v2084_v60  ;;  %v1774_v59 = vsel %vm1767_vm0, %v1770_v61, %v1773_v21  ;;  %vm4804_vm13 = vcmp.le.f32.partialorder %v1880_v16, 0.7853982 }
 0x35d   : > { %v4697_v63 = vsel %vm1764_vm12, nan, %v2085_v22  ;;  %v1775_v13 = vsel %vm1764_vm12, nan, %v1774_v59  ;;  %vm2839_vm12 = vcmp.lt.s32.totalorder %v2838_v56, 0  ;;  %v2455_v59 = vld [vmem:[%s3878_s12] sm:$0xff] }
 0x35e   : > { %v1634_v48 = vpop.f32.mrb[70].mxu0  ;;  %v2293_v20 = vsub.f32 0.0, %v1775_v13  ;;  %v2296_v41 = vmul.f32 %v4697_v63, %v4413_v29  ;;  %2356 = vst [vmem:[#allocation2] sm:$0xff] %v1775_v13  ;;  %v2389_v14 = vadd.f32 %v2386_v38, %v1775_v13  ;;  %v2299_v2 = vmul.f32 %v4697_v63, %v4446_v17  ;;  %v2416_v29 = vld [vmem:[%s3874_s30 + $0x48] sm:$0xff] }
 0x35f   : > { %v3314_v30 = vpop.f32.mrb[71].mxu0  ;;  %v2302_v31 = vmul.f32 %v4697_v63, %v4502_v23  ;;  %v2305_v34 = vmul.f32 %v4697_v63, %v4530_v62  ;;  %v2332_v11 = vmul.f32 %v4697_v63, %v4579_v5  ;;  %v1951_v12 = vsel %vm2839_vm12, 0, %v2838_v56 }
 0x360   : > { %v2320_v17 = vmul.f32 %v4640_v19, %v2293_v20  ;;  %2359 = vst [vmem:[#allocation2 + $0x18] sm:$0xff] %v2296_v41  ;;  %2392 = vst.msk [vmem:[#allocation2] sm:$0xff] %vm639_vm2, %v2389_v14  ;;  %v2419_v25 = vadd.f32 %v2407_v1, %v2296_v41  ;;  %v2323_v47 = vmul.f32 %v4650_v35, %v2293_v20  ;;  %v1952_v23 = vsub.s32 32, %v1951_v12 }
 0x361   : > { %2362 = vst [vmem:[#allocation2 + $0x30] sm:$0xff] %v2299_v2  ;;  %v1953_v50 = vshll.u32 %v4642_v24, %v1951_v12  ;;  %v1956_v40 = vsub.s32 4294967266, %v1951_v12  ;;  %v2422_v62 = vadd.f32 %v2410_v6, %v2299_v2  ;;  %2365 = vst [vmem:[#allocation2 + $0x48] sm:$0xff] %v2302_v31  ;;  %v3543_v5 = vpop.eup %3542  ;;  %v2326_v19 = vmul.f32 %v2314_v9, %v2293_v20 }
 0x362   : > { %2368 = vst [vmem:[#allocation2 + $0x60] sm:$0xff] %v2305_v34  ;;  %v4725_v60 = vpop.f32.mrb[72].mxu0  ;;  %2431 = vst.msk [vmem:[#allocation2 + $0x18] sm:$0xff] %vm639_vm2, %v2419_v25  ;;  %v2425_v7 = vadd.f32 %v2413_v33, %v2302_v31  ;;  %v4729_v18 = vmul.f32 %v2317_v52, %v2293_v20  ;;  %v2428_v35 = vadd.f32 %v2416_v29, %v2305_v34  ;;  %v3545_v61 = vpop.eup %3544  ;;  %v1876_v21 = vxor.u32 2147483648, %v3543_v5  ;;  %v2408_v25 = vld [vmem:[%s3874_s30 + $0x8] sm:$0xff] }
 0x363   : > { %v3317_v46 = vpop.f32.mrb[73].mxu0  ;;  %v1954_v24 = vshrl.u32 %v4674_v27, %v1952_v23  ;;  %v1957_v38 = vadd.s32 127, %v1956_v40  ;;  %2434 = vst.msk [vmem:[#allocation2 + $0x30] sm:$0xff] %vm639_vm2, %v2422_v62  ;;  %v2344_v22 = vadd.f32 %v2332_v11, %v2320_v17  ;;  %v1873_v56 = vxor.u32 2147483648, %v3545_v61 }
 0x364   : > { %v4737_v9 = vsel %vm1882_vm4, %v1966_v58, %v4632_v55  ;;  %2437 = vst.msk [vmem:[#allocation2 + $0x48] sm:$0xff] %vm639_vm2, %v2425_v7  ;;  %2440 = vst.msk [vmem:[#allocation2 + $0x60] sm:$0xff] %vm639_vm2, %v2428_v35  ;;  %v2335_v27 = vmul.f32 %v4697_v63, %v4634_v0  ;;  %v2338_v52 = vmul.f32 %v4697_v63, %v1634_v48  ;;  %v2458_v55 = vld [vmem:[%s3878_s12 + $0x18] sm:$0xff]  ;;  %v2387_v48 = vld [vmem:[%s3887_s16 + $0x8] sm:$0xff] }
 0x365   : > { %v2187_v13 = vsel %vm2185_vm5, %v1876_v21, %v3545_v61  ;;  %v1955_v1 = vor.u32 %v1954_v24, %v1953_v50  ;;  %v1958_v20 = vshll.u32 %v1957_v38, 23  ;;  %v1877_v41 = vsel %vm1875_vm6, %v1876_v21, %v3545_v61  ;;  %2371 = vst [vmem:[#allocation2 + $0x78] sm:$0xff] %v2344_v22  ;;  %v2417_v21 = vld [vmem:[%s3874_s30 + $0x50] sm:$0xff] }
 0x366   : > { %v4749_v58 = vpop.f32.mrb[74].mxu0  ;;  %v2184_v14 = vsel %vm2182_vm7, %v3543_v5, %v1873_v56  ;;  %v1874_v0 = vsel %vm1872_vm8, %v3543_v5, %v1873_v56  ;;  %v2467_v2 = vadd.f32 %v2455_v59, %v2344_v22  ;;  %v2347_v6 = vadd.f32 %v2335_v27, %v2323_v47  ;;  %v2411_v47 = vld [vmem:[%s3874_s30 + $0x20] sm:$0xff]  ;;  %v2414_v5 = vld [vmem:[%s3874_s30 + $0x38] sm:$0xff] }
 0x367   : > { %v3320_v30 = vpop.f32.mrb[75].mxu0  ;;  %v2188_v31 = vsel %vm2181_vm9, %v2184_v14, %v2187_v13  ;;  %v1959_v33 = vor.u32 4788187, %v1958_v20  ;;  %v1962_v34 = vcvt.s32.f32 %v1955_v1  ;;  %v1878_v29 = vsel %vm1871_vm10, %v1874_v0, %v1877_v41  ;;  %v2491_v11 = vld [vmem:[#allocation2] sm:$0xff]  ;;  %v2462_v0 = vld [vmem:[%s3878_s12 + $0x38] sm:$0xff] }
 0x368   : > { %v2189_v12 = vsel %vm1868_vm11, nan, %v2188_v31  ;;  %v1879_v17 = vsel %vm1868_vm11, nan, %v1878_v29  ;;  %2479 = vst.msk [vmem:[#allocation2 + $0x78] sm:$0xff] %vm639_vm2, %v2467_v2  ;;  %2374 = vst [vmem:[#allocation2 + $0x90] sm:$0xff] %v2347_v6  ;;  %v2470_v15 = vadd.f32 %v2458_v55, %v2347_v6  ;;  %v2350_v23 = vadd.f32 %v2338_v52, %v2326_v19  ;;  %v2456_v13 = vld [vmem:[%s3878_s12 + $0x8] sm:$0xff]  ;;  %v2465_v29 = vld [vmem:[%s3878_s12 + $0x50] sm:$0xff] }
 0x369   : > { %2494 = vst [vmem:[%s4769_s0] sm:$0xff] %v2491_v11  ;;  %v1960_v45 = vand.u32 2147483647, %v1959_v33  ;;  %v2497_v50 = vld [vmem:[#allocation2 + $0x18] sm:$0xff]  ;;  %v2294_v40 = vsub.f32 0.0, %v1879_v17  ;;  %v2297_v8 = vmul.f32 %v2189_v12, %v4424_v42  ;;  %2357 = vst [vmem:[#allocation2 + $0x8] sm:$0xff] %v1879_v17  ;;  %v2390_v62 = vadd.f32 %v2387_v48, %v1879_v17 }
 0x36a   : > { %v1649_v7 = vpop.f32.mrb[76].mxu0  ;;  %2509 = vst [vmem:[%s4775_s2] sm:$0xff] %v2497_v50  ;;  %v2500_v19 = vld [vmem:[#allocation2 + $0x30] sm:$0xff]  ;;  %v2300_v35 = vmul.f32 %v2189_v12, %v4468_v39  ;;  %v2303_v46 = vmul.f32 %v2189_v12, %v4512_v36  ;;  %v2306_v61 = vmul.f32 %v2189_v12, %v4544_v3  ;;  %v2333_v42 = vmul.f32 %v2189_v12, %v4601_v37  ;;  %v2461_v37 = vld [vmem:[%s3878_s12 + $0x30] sm:$0xff] }
 0x36b   : > { %2482 = vst.msk [vmem:[#allocation2 + $0x90] sm:$0xff] %vm639_vm2, %v2470_v15  ;;  %2377 = vst [vmem:[#allocation2 + $0xa8] sm:$0xff] %v2350_v23  ;;  %v3323_v24 = vpop.f32.mrb[77].mxu0  ;;  %v1963_v38 = vmul.f32 %v1962_v34, %v1960_v45  ;;  %v2321_v22 = vmul.f32 %v4646_v26, %v2294_v40  ;;  %v2420_v39 = vadd.f32 %v2408_v25, %v2297_v8  ;;  %v2503_v3 = vld [vmem:[#allocation2 + $0x48] sm:$0xff]  ;;  %v2506_v59 = vld [vmem:[#allocation2 + $0x60] sm:$0xff]  ;;  %v1969_v17 = vsel %vm4804_vm13, 0, %v4737_v9 }
 0x36c   : > { %2360 = vst [vmem:[#allocation2 + $0x20] sm:$0xff] %v2297_v8  ;;  %2393 = vst.msk [vmem:[#allocation2 + $0x8] sm:$0xff] %vm639_vm2, %v2390_v62  ;;  %v2324_v36 = vmul.f32 %v4654_v28, %v2294_v40  ;;  %v2423_v56 = vadd.f32 %v2411_v47, %v2300_v35  ;;  %v2327_v27 = vmul.f32 %v4680_v43, %v2294_v40  ;;  %v2459_v43 = vld [vmem:[%s3878_s12 + $0x20] sm:$0xff]  ;;  %v2464_v34 = vld [vmem:[%s3878_s12 + $0x48] sm:$0xff]  ;;  %v1973_v8 = vadd.s32 3, %v1969_v17 }
 0x36d   : > { %2512 = vst [vmem:[%s4775_s2 + $0x18] sm:$0xff] %v2500_v19  ;;  %2363 = vst [vmem:[#allocation2 + $0x38] sm:$0xff] %v2300_v35  ;;  %v2426_v52 = vadd.f32 %v2414_v5, %v2303_v46  ;;  %v2330_v26 = vmul.f32 %v4693_v54, %v2294_v40  ;;  %v1964_v1 = vxor.u32 2147483648, %v1963_v38  ;;  %v2429_v28 = vadd.f32 %v2417_v21, %v2306_v61 }
 0x36e   : > { %2515 = vst [vmem:[%s4775_s2 + $0x30] sm:$0xff] %v2503_v3  ;;  %2366 = vst [vmem:[#allocation2 + $0x50] sm:$0xff] %v2303_v46  ;;  %v2345_v20 = vadd.f32 %v2333_v42, %v2321_v22  ;;  %v2336_v41 = vmul.f32 %v2189_v12, %v4656_v32  ;;  %v1654_v55 = vpop.f32.mrb[78].mxu0  ;;  %v2473_v14 = vadd.f32 %v2461_v37, %v2350_v23  ;;  %v1974_v46 = vand.u32 3, %v1973_v8  ;;  %v2415_v32 = vld [vmem:[%s3874_s30 + $0x40] sm:$0xff] }
 0x36f   : > { %2518 = vst [vmem:[%s4775_s2 + $0x48] sm:$0xff] %v2506_v59  ;;  %2369 = vst [vmem:[#allocation2 + $0x68] sm:$0xff] %v2306_v61  ;;  %v2339_v54 = vmul.f32 %v2189_v12, %v4725_v60  ;;  %v2341_v48 = vmul.f32 %v4697_v63, %v1649_v7  ;;  %v2342_v2 = vmul.f32 %v2189_v12, %v1654_v55  ;;  %v3326_v6 = vpop.f32.mrb[79].mxu0  ;;  %v2521_v31 = vld [vmem:[#allocation2 + $0x78] sm:$0xff]  ;;  %v2283_v61 = vand.u32 3, %v1969_v17  ;;  %v2409_v55 = vld [vmem:[%s3874_s30 + $0x10] sm:$0xff] }
 0x370   : > { %2432 = vst.msk [vmem:[#allocation2 + $0x20] sm:$0xff] %vm639_vm2, %v2420_v39  ;;  %2435 = vst.msk [vmem:[#allocation2 + $0x38] sm:$0xff] %vm639_vm2, %v2423_v56  ;;  %v1965_v30 = vsel %vm1882_vm4, %v1964_v1, %v1963_v38  ;;  %v2468_v33 = vadd.f32 %v2456_v13, %v2345_v20  ;;  %v2348_v60 = vadd.f32 %v2336_v41, %v2324_v36  ;;  %vm1979_vm0 = vcmp.eq.s32.totalorder %v1974_v46, 2 }
 0x371   : > { %2438 = vst.msk [vmem:[#allocation2 + $0x50] sm:$0xff] %vm639_vm2, %v2426_v52  ;;  %2441 = vst.msk [vmem:[#allocation2 + $0x68] sm:$0xff] %vm639_vm2, %v2429_v28  ;;  %v1968_v63 = vsel %vm4804_vm13, %v4410_v10, %v1965_v30  ;;  %v2351_v16 = vadd.f32 %v2339_v54, %v2327_v27  ;;  %v2353_v11 = vadd.f32 %v2341_v48, %v4729_v18  ;;  %vm2288_vm15 = vcmp.eq.s32.totalorder %v2283_v61, 2  ;;  %v2388_v52 = vld [vmem:[%s3887_s16 + $0x10] sm:$0xff]  ;;  %v2418_v30 = vld [vmem:[%s3874_s30 + $0x58] sm:$0xff] }
 0x372   : > { %2372 = vst [vmem:[#allocation2 + $0x80] sm:$0xff] %v2345_v20  ;;  %2533 = vst [vmem:[%s4817_s3] sm:$0xff] %v2521_v31  ;;  %v2354_v12 = vadd.f32 %v2342_v2, %v2330_v26  ;;  %3546 = vcosq.f32 %v1968_v63  ;;  %v2524_v25 = vld [vmem:[#allocation2 + $0x90] sm:$0xff]  ;;  %v2471_v47 = vadd.f32 %v2459_v43, %v2348_v60  ;;  %v4826_v15 = vpop.f32.mrb[80].mxu0  ;;  %vm2285_vm1 = vcmp.eq.s32.totalorder %v2283_v61, 0  ;;  %v2412_v43 = vld [vmem:[%s3874_s30 + $0x28] sm:$0xff]  ;;  %s2569_s30 = sshll.u32 %s4769_s0, 4  ;;  %s4891_s30 = int_to_ptr.vmem [resolvable:$true] %s2569_s30 }
 0x373   : > { %2485 = vst.msk [vmem:[#allocation2 + $0xa8] sm:$0xff] %vm639_vm2, %v2473_v14  ;;  %2480 = vst.msk [vmem:[#allocation2 + $0x80] sm:$0xff] %vm639_vm2, %v2468_v33  ;;  %3548 = vsinq.f32 %v1968_v63  ;;  %v2474_v23 = vadd.f32 %v2462_v0, %v2351_v16  ;;  %v2476_v18 = vadd.f32 %v2464_v34, %v2353_v11  ;;  %v3329_v45 = vpop.f32.mrb[81].mxu0  ;;  %v2492_v50 = vld [vmem:[#allocation2 + $0x8] sm:$0xff]  ;;  %vm1976_vm3 = vcmp.eq.s32.totalorder %v1974_v46, 0  ;;  %s3550_s25 = scalar_lea.vmem %s4891_s30, 384  ;;  %p3557_p3 = scmp.lt.s32.totalorder %s4891_s30, %s3555_s22 }
 0x374   : > { %2375 = vst [vmem:[#allocation2 + $0x98] sm:$0xff] %v2348_v60  ;;  %2536 = vst [vmem:[%s4817_s3 + $0x18] sm:$0xff] %v2524_v25  ;;  %v2477_v9 = vadd.f32 %v2465_v29, %v2354_v12  ;;  %vm2284_vm4 = vcmp.lt.s32.totalorder %v2283_v61, 2  ;;  %vm1975_vm5 = vcmp.lt.s32.totalorder %v1974_v46, 2  ;;  %v2310_v1 = vmul.f32 %v4432_v57, %v4432_v57  ;;  %p3551_p0 = scmp.ne.s32.totalorder %s4891_s30, %s3550_s25  ;;  %p3558_p4 = scmp.lt.s32.totalorder %s3556_s14, %s3550_s25 }
 0x375   : > { %2378 = vst [vmem:[#allocation2 + $0xb0] sm:$0xff] %v2351_v16  ;;  %2380 = vst [vmem:[#allocation2 + $0xc0] sm:$0xff] %v2353_v11  ;;  %v2313_v28 = vmul.f32 %v4480_v53, %v4480_v53  ;;  %v2316_v14 = vmul.f32 %v4520_v49, %v4520_v49  ;;  %v2319_v54 = vmul.f32 %v4554_v44, %v4554_v44  ;;  %v2457_v16 = vld [vmem:[%s3878_s12 + $0x10] sm:$0xff] }
 0x376   : > { %2381 = vst [vmem:[#allocation2 + $0xc8] sm:$0xff] %v2354_v12  ;;  %2483 = vst.msk [vmem:[#allocation2 + $0x98] sm:$0xff] %vm639_vm2, %v2471_v47  ;;  %v2463_v47 = vld [vmem:[%s3878_s12 + $0x40] sm:$0xff]  ;;  %p3552_p1 = pnand %p3551_p0, %p3747_p6  ;;  %p3559_p5 = por %p3558_p4, %p3557_p3 }
 0x377   : > { %2495 = vst [vmem:[%s4769_s0 + $0x8] sm:$0xff] %v2492_v50  ;;  %v2498_v40 = vld [vmem:[#allocation2 + $0x20] sm:$0xff]  ;;  %2486 = vst.msk [vmem:[#allocation2 + $0xb0] sm:$0xff] %vm639_vm2, %v2474_v23  ;;  %v2501_v62 = vld [vmem:[#allocation2 + $0x38] sm:$0xff] }
 0x378   : > { %2488 = vst.msk [vmem:[#allocation2 + $0xc0] sm:$0xff] %vm639_vm2, %v2476_v18  ;;  %2489 = vst.msk [vmem:[#allocation2 + $0xc8] sm:$0xff] %vm639_vm2, %v2477_v9  ;;  %v2504_v5 = vld [vmem:[#allocation2 + $0x50] sm:$0xff]  ;;  %v2507_v7 = vld [vmem:[#allocation2 + $0x68] sm:$0xff]  ;;  %p3553_p2 = pneg %p3552_p1 }
 0x379   : > { %2510 = vst [vmem:[%s4775_s2 + $0x8] sm:$0xff] %v2498_v40  ;;  %2513 = vst [vmem:[%s4775_s2 + $0x20] sm:$0xff] %v2501_v62  ;;  %v2466_v23 = vld [vmem:[%s3878_s12 + $0x58] sm:$0xff] }
 0x37a   : > { %2516 = vst [vmem:[%s4775_s2 + $0x38] sm:$0xff] %v2504_v5  ;;  %2519 = vst [vmem:[%s4775_s2 + $0x50] sm:$0xff] %v2507_v7  ;;  %v2527_v19 = vld [vmem:[#allocation2 + $0xa8] sm:$0xff]  ;;  %v2522_v35 = vld [vmem:[#allocation2 + $0x80] sm:$0xff]  ;;  %p3560_p7 = pnand %p3559_p5, %p3553_p2 }
 0x37b   : > { %2539 = vst [vmem:[%s4817_s3 + $0x30] sm:$0xff] %v2527_v19  ;;  %2534 = vst [vmem:[%s4817_s3 + $0x8] sm:$0xff] %v2522_v35 }
 0x37c   : > { %v3547_v42 = vpop.eup %3546 }
 0x37d   : > { %v2525_v21 = vld [vmem:[#allocation2 + $0x98] sm:$0xff]  ;;  %v3549_v39 = vpop.eup %3548  ;;  %v1980_v36 = vxor.u32 2147483648, %v3547_v42 }
 0x37e   : > { %2537 = vst [vmem:[%s4817_s3 + $0x20] sm:$0xff] %v2525_v21  ;;  %v2528_v24 = vld [vmem:[#allocation2 + $0xb0] sm:$0xff]  ;;  %v1977_v3 = vxor.u32 2147483648, %v3549_v39 }
 0x37f   : > { %v2530_v38 = vld [vmem:[#allocation2 + $0xc0] sm:$0xff]  ;;  %v2531_v22 = vld [vmem:[#allocation2 + $0xc8] sm:$0xff]  ;;  %2540 = vst [vmem:[%s4817_s3 + $0x38] sm:$0xff] %v2528_v24  ;;  %v2290_v59 = vsel %vm2288_vm15, %v1980_v36, %v3549_v39  ;;  %v1981_v37 = vsel %vm1979_vm0, %v1980_v36, %v3549_v39 }
 0x380   : > { %2542 = vst [vmem:[%s4817_s3 + $0x48] sm:$0xff] %v2530_v38  ;;  %2543 = vst [vmem:[%s4817_s3 + $0x50] sm:$0xff] %v2531_v22  ;;  %v2287_v56 = vsel %vm2285_vm1, %v3547_v42, %v1977_v3  ;;  %v1978_v27 = vsel %vm1976_vm3, %v3547_v42, %v1977_v3 }
 0x381   : > { %v2291_v26 = vsel %vm2284_vm4, %v2287_v56, %v2290_v59  ;;  %v1982_v13 = vsel %vm1975_vm5, %v1978_v27, %v1981_v37 }
 0x382   : > { %v2292_v20 = vsel %vm1972_vm14, nan, %v2291_v26  ;;  %v1983_v41 = vsel %vm1972_vm14, nan, %v1982_v13 }
 0x383   : > { %v2295_v0 = vsub.f32 0.0, %v1983_v41  ;;  %v2298_v48 = vmul.f32 %v2292_v20, %v4432_v57  ;;  %2358 = vst [vmem:[#allocation2 + $0x10] sm:$0xff] %v1983_v41  ;;  %v2391_v2 = vadd.f32 %v2388_v52, %v1983_v41  ;;  %v2301_v6 = vmul.f32 %v2292_v20, %v4480_v53 }
 0x384   : > { %v2304_v10 = vmul.f32 %v2292_v20, %v4520_v49  ;;  %v2307_v31 = vmul.f32 %v2292_v20, %v4554_v44  ;;  %v2334_v33 = vmul.f32 %v2292_v20, %v4622_v51  ;;  %v2337_v60 = vmul.f32 %v2292_v20, %v4669_v4  ;;  %v2460_v4 = vld [vmem:[%s3878_s12 + $0x28] sm:$0xff]  ;;  %s2546_s12 = scalar_lea.sflag [#allocation6], %s3850_s27 }
 0x385   : > { %v2322_v34 = vmul.f32 %v2310_v1, %v2295_v0  ;;  %2361 = vst [vmem:[#allocation2 + $0x28] sm:$0xff] %v2298_v48  ;;  %2394 = vst.msk [vmem:[#allocation2 + $0x10] sm:$0xff] %vm639_vm2, %v2391_v2  ;;  %v2421_v57 = vadd.f32 %v2409_v55, %v2298_v48  ;;  %v2325_v29 = vmul.f32 %v2313_v28, %v2295_v0 }
 0x386   : > { %2364 = vst [vmem:[#allocation2 + $0x40] sm:$0xff] %v2301_v6  ;;  %v2424_v53 = vadd.f32 %v2412_v43, %v2301_v6  ;;  %v2328_v63 = vmul.f32 %v2316_v14, %v2295_v0  ;;  %2367 = vst [vmem:[#allocation2 + $0x58] sm:$0xff] %v2304_v10  ;;  %v2427_v49 = vadd.f32 %v2415_v32, %v2304_v10 }
 0x387   : > { %v2331_v44 = vmul.f32 %v2319_v54, %v2295_v0  ;;  %2370 = vst [vmem:[#allocation2 + $0x70] sm:$0xff] %v2307_v31  ;;  %v2430_v51 = vadd.f32 %v2418_v30, %v2307_v31  ;;  %2433 = vst.msk [vmem:[#allocation2 + $0x28] sm:$0xff] %vm639_vm2, %v2421_v57  ;;  %v2346_v11 = vadd.f32 %v2334_v33, %v2322_v34 }
 0x388   : > { %2436 = vst.msk [vmem:[#allocation2 + $0x40] sm:$0xff] %vm639_vm2, %v2424_v53  ;;  %v2349_v12 = vadd.f32 %v2337_v60, %v2325_v29  ;;  %v2340_v17 = vmul.f32 %v2292_v20, %v4749_v58  ;;  %v2343_v25 = vmul.f32 %v2292_v20, %v4826_v15  ;;  %2439 = vst.msk [vmem:[#allocation2 + $0x58] sm:$0xff] %vm639_vm2, %v2427_v49 }
 0x389   : > { %2442 = vst.msk [vmem:[#allocation2 + $0x70] sm:$0xff] %vm639_vm2, %v2430_v51  ;;  %2373 = vst [vmem:[#allocation2 + $0x88] sm:$0xff] %v2346_v11  ;;  %v2469_v18 = vadd.f32 %v2457_v16, %v2346_v11 }
 0x38a   : > { %2376 = vst [vmem:[#allocation2 + $0xa0] sm:$0xff] %v2349_v12  ;;  %v2472_v9 = vadd.f32 %v2460_v4, %v2349_v12  ;;  %v2352_v45 = vadd.f32 %v2340_v17, %v2328_v63  ;;  %v2355_v50 = vadd.f32 %v2343_v25, %v2331_v44 }
 0x38b   : > { %2481 = vst.msk [vmem:[#allocation2 + $0x88] sm:$0xff] %vm639_vm2, %v2469_v18 }
 0x38c   : > { %2484 = vst.msk [vmem:[#allocation2 + $0xa0] sm:$0xff] %vm639_vm2, %v2472_v9  ;;  %2379 = vst [vmem:[#allocation2 + $0xb8] sm:$0xff] %v2352_v45  ;;  %v2475_v58 = vadd.f32 %v2463_v47, %v2352_v45  ;;  %v2478_v15 = vadd.f32 %v2466_v23, %v2355_v50  ;;  %v2493_v40 = vld [vmem:[#allocation2 + $0x10] sm:$0xff] }
 0x38d   : > { %2382 = vst [vmem:[#allocation2 + $0xd0] sm:$0xff] %v2355_v50  ;;  %2496 = vst [vmem:[%s4769_s0 + $0x10] sm:$0xff] %v2493_v40 }
 0x38e   : > { %2487 = vst.msk [vmem:[#allocation2 + $0xb8] sm:$0xff] %vm639_vm2, %v2475_v58  ;;  %2490 = vst.msk [vmem:[#allocation2 + $0xd0] sm:$0xff] %vm639_vm2, %v2478_v15  ;;  %v2499_v8 = vld [vmem:[#allocation2 + $0x28] sm:$0xff] }
 0x38f   : > { %v2502_v62 = vld [vmem:[#allocation2 + $0x40] sm:$0xff] }
 0x390   : > { %3563 = shalt.err (!%p3560_p7)
}
 0x391   : > { %s3564_s0 = scalar_lea.hbm %s4887_s15, 384  ;;  %s3568_s1 = scalar_lea.hbm %s5001_s9, 768 }
 0x392   : > { %p3565_p10 = scmp.ne.s32.totalorder %s4887_s15, %s3564_s0  ;;  %p3569_p13 = scmp.lt.u32.totalorder %s4887_s15, %s5001_s9 }
 0x393   : > { %p3570_p0 = scmp.lt.u32.totalorder %s3568_s1, %s3564_s0  ;;  %p3572_p2 = scmp.lt.u32.totalorder %s3564_s0, %s4887_s15 }
 0x394   : > { %p3566_p11 = pnand %p3565_p10, %p3747_p6 }
 0x395   : > { %p3571_p1 = por %p3570_p0, %p3569_p13 }
 0x396   : > { %p3567_p12 = pneg %p3566_p11 }
 0x397   : > { %p3573_p3 = por %p3572_p2, %p3571_p1 }
 0x399   : > { %p3574_p4 = pnand %p3573_p3, %p3567_p12 }
 0x39b   : > { %3577 = shalt.err (!%p3574_p4)
}
 0x39c   : > { %s3628_s25 = smov 128   ;;  %s3629_s13 = smov 8   ;;  %2511 = vst [vmem:[%s4775_s2 + $0x10] sm:$0xff] %v2499_v8  ;;  %2514 = vst [vmem:[%s4775_s2 + $0x28] sm:$0xff] %v2502_v62  ;;  %v2505_v5 = vld [vmem:[#allocation2 + $0x58] sm:$0xff]  ;;  %v2508_v7 = vld [vmem:[#allocation2 + $0x70] sm:$0xff] }
 0x39d   : > { %3434 = dma.vmem_to_hbm [thread:$0]  (%p3747_p6), %s4891_s30, 384, %s4887_s15, %s2546_s12, %s3628_s25, %s3628_s25, %s3629_s13   ;;  %v2523_v19 = vld [vmem:[#allocation2 + $0x88] sm:$0xff]  ;;  %v2526_v35 = vld [vmem:[#allocation2 + $0xa0] sm:$0xff]  ;;  %v2529_v46 = vld [vmem:[#allocation2 + $0xb8] sm:$0xff] }
 0x39e   : > { %2517 = vst [vmem:[%s4775_s2 + $0x40] sm:$0xff] %v2505_v5  ;;  %2520 = vst [vmem:[%s4775_s2 + $0x58] sm:$0xff] %v2508_v7  ;;  %v2532_v61 = vld [vmem:[#allocation2 + $0xd0] sm:$0xff]  ;;  %s5023_s14 = sand.u32 1, %s3725_s21  }
 0x39f   : > { %2535 = vst [vmem:[%s4817_s3 + $0x10] sm:$0xff] %v2523_v19  ;;  %2538 = vst [vmem:[%s4817_s3 + $0x28] sm:$0xff] %v2526_v35  ;;  %s4930_s0 = scalar_lea.sflag [#allocation8], %s5023_s14 }
 0x3a0   : > { %2541 = vst [vmem:[%s4817_s3 + $0x40] sm:$0xff] %v2529_v46  ;;  %2544 = vst [vmem:[%s4817_s3 + $0x58] sm:$0xff] %v2532_v61 }
 0x3a1   : > { %s2584_s15 = scalar_lea.hbm %s5002_s10, %s4872_s24  ;;  %s2601_s12 = sshll.u32 %s4775_s2, 4  ;;  %s2602_s12 = int_to_ptr.vmem [resolvable:$true] %s2601_s12 }
 0x3a2   : > { %s3630_s16 = smov 384   ;;  %s3631_s21 = smov 768  }
 0x3a3   : > { %3435 = sst [smem:[#allocation11]] (%p3747_p6), %s3630_s16  ;;  %s3632_s26 = smov 3  }
 0x3a4   : > { %3436 = sst [smem:[#allocation11 + $0x1]] (%p3747_p6), %s3631_s21  ;;  %s3633_s1 = smov 128  }
 0x3a5   : > { %3437 = sst [smem:[#allocation11 + $0x2]] (%p3747_p6), %s3632_s26  ;;  %s3634_s22 = smov 8  }
 0x3a6   : > { %3438 = sst [smem:[#allocation11 + $0x3]] (%p3747_p6), %s3633_s1  ;;  %s3635_s25 = smov [#allocation10]  }
 0x3a7   : > { %3439 = sst [smem:[#allocation11 + $0x4]] (%p3747_p6), %s3633_s1  ;;  %s3636_s2 = smov 0  }
 0x3a8   : > { %3440 = sst [smem:[#allocation11 + $0x5]] (%p3747_p6), %s3634_s22 }
 0x3a9   : > { %3441 = dma.general (%p3747_p6), %s2602_s12, 1536, %s2584_s15, %s4930_s0, %s3635_s25, [#allocation11], %s3636_s2, 0  }
 0x3aa   : > { %s2629_s27 = scalar_lea.hbm %s5003_s11, %s4872_s24  ;;  %s2646_s30 = sshll.u32 %s4817_s3, 4  ;;  %s2647_s30 = int_to_ptr.vmem [resolvable:$true] %s2646_s30 }
 0x3ab   : > { %s3637_s16 = smov 384   ;;  %s3638_s15 = smov 768  }
 0x3ac   : > { %3442 = sst [smem:[#allocation13]] (%p3747_p6), %s3637_s16  ;;  %s3639_s12 = smov 3  }
 0x3ad   : > { %3443 = sst [smem:[#allocation13 + $0x1]] (%p3747_p6), %s3638_s15  ;;  %s3640_s21 = smov 128  }
 0x3ae   : > { %3444 = sst [smem:[#allocation13 + $0x2]] (%p3747_p6), %s3639_s12  ;;  %s3641_s26 = smov 8  }
 0x3af   : > { %3445 = sst [smem:[#allocation13 + $0x3]] (%p3747_p6), %s3640_s21  ;;  %s3642_s24 = smov [#allocation12]  }
 0x3b0   : > { %3446 = sst [smem:[#allocation13 + $0x4]] (%p3747_p6), %s3640_s21  ;;  %s3643_s3 = smov 0  }
 0x3b1   : > { %3447 = sst [smem:[#allocation13 + $0x5]] (%p3747_p6), %s3641_s26 }
 0x3b2   : > { %3448 = dma.general (%p3747_p6), %s2647_s30, 1536, %s2629_s27, %s4930_s0, %s3642_s24, [#allocation13], %s3643_s3, 0  }
 0x3b3 PF: > { %s2674_s1 = sand.u32 1, %s3604_s17   ;;  %p3453_p5 = pnand %p2820_p9, %p3753_p8 }
 0x3b4   : > { %s2675_s22 = scalar_lea.sflag [#allocation6], %s2674_s1 }
 0x3b5   : > { %3595 = dma.done.wait (!%p3453_p5), %s2675_s22, 384  }
 0x3b6   : > { %3597 = vsyncadd (!%p3453_p5), %s2675_s22, 4294966912  ;;  %s5024_s25 = sadd.s32 4294967294, %s3616_s20  }
 0x3b7   : > { %s2683_s2 = sand.u32 1, %s5024_s25  }
 0x3b8   : > { %s2684_s13 = scalar_lea.sflag [#allocation8], %s2683_s2 }
 0x3b9   : > { %3599 = dma.done.wait (!%p3453_p5), %s2684_s13, 3072  }
 0x3ba   : > { %3601 = vsyncadd (!%p3453_p5), %s2684_s13, 4294964224  ;;  %s5025_s28 = sld [smem:[#allocation16_spill]]  ;;  %p25_p6 = scmp.ge.s32.totalorder %s3729_s23, 4  }
 0x3bb   : > { %s5026_s17 = smov %s3608_s18  ;;  %s5027_s18 = smov %s3612_s19 }
 0x3bc   : > { %s5029_s20 = smov %s3729_s23  ;;  %27 = sbr.rel (!%p25_p6) target bundleno = 10 (0xa), region = 225 }
 0x3c0   : > { %s5028_s19 = smov %s5025_s28 }
 0x3c3   :  { %2698 = vsyncpa [#allocation6], 1 }
 0x3c4   :  { %2700 = vsyncpa [#allocation6 + $0x1], 1 }
 0x3c5   :  { %2701 = vsyncpa [#allocation8], 1 }
 0x3c6   :  { %2703 = vsyncpa [#allocation8 + $0x1], 1 }

</bundles_post_ra>
